<compile_context>
chip_gen: v7x
topology: tpu7x:2x2x1
jax: 0.10.0
libtpu: 0.0.40
codegen_flags: <defaults>
</compile_context>

<pallas_src>
import functools

import jax
import jax.numpy as jnp
from jax import lax
from jax.experimental import pallas as pl
from jax.experimental.pallas import tpu as pltpu


def mha_kernel(q_ref, k_ref, v_ref, wq_ref, wk_ref, wv_ref, wfc_ref,
               gamma_ref, beta_ref, o_ref, *rest,
               n_head, d_k, d_v, eps, return_attn):
    if return_attn:
        attn_ref, kproj_ref, vproj_ref = rest
    else:
        kproj_ref, vproj_ref = rest
        attn_ref = None

    # --- K/V projections: once per batch (first q tile), cached in bf16 VMEM
    # scratch. The "arbitrary" q-tile axis carries the scratch across tiles.
    @pl.when(pl.program_id(1) == 0)
    def _():
        k_bf = k_ref[0].astype(jnp.bfloat16)
        v_bf = v_ref[0].astype(jnp.bfloat16)
        kproj_ref[...] = jnp.dot(
            k_bf, wk_ref[...].astype(jnp.bfloat16),
            preferred_element_type=jnp.float32).astype(jnp.bfloat16)
        vproj_ref[...] = jnp.dot(
            v_bf, wv_ref[...].astype(jnp.bfloat16),
            preferred_element_type=jnp.float32).astype(jnp.bfloat16)

    q_in = q_ref[0]                                             # (tq, d_model)

    # Q projection: bf16 operands, f32 accumulation on the MXU.
    q_proj = jnp.dot(q_in.astype(jnp.bfloat16),
                     wq_ref[...].astype(jnp.bfloat16),
                     preferred_element_type=jnp.float32)        # (tq, H*d_k)

    scale = 1.0 / (d_k ** 0.5)
    wfc_bf = wfc_ref[...].astype(jnp.bfloat16)                  # (H*d_v, d_model)

    # Residual in f32; per-head output projections accumulate directly into it
    # (replaces the head concat + single fc matmul).
    y = q_in.astype(jnp.float32)

    for h in range(n_head):  # n_head is static and small
        # Fold the 1/sqrt(d_k) scale into the narrow (tq, d_k) q slice.
        qh = (q_proj[:, h * d_k:(h + 1) * d_k] * scale).astype(jnp.bfloat16)
        kh = kproj_ref[:, h * d_k:(h + 1) * d_k]                # bf16 (Lk, d_k)
        vh = vproj_ref[:, h * d_v:(h + 1) * d_v]                # bf16 (Lk, d_v)

        # scores = (qh / temp) @ kh^T, f32 accumulation.
        scores = lax.dot_general(
            qh, kh, (((1,), (1,)), ((), ())),
            preferred_element_type=jnp.float32)                 # (tq, Lk)

        # Numerically-stable softmax over keys; EUP reciprocal for the denom.
        scores = scores - jnp.max(scores, axis=-1, keepdims=True)
        e = jnp.exp(scores)
        denom = jnp.sum(e, axis=-1, keepdims=True)
        attn_h = e * pl.reciprocal(denom, approx=True)          # (tq, Lk)

        if return_attn:
            attn_ref[0, h] = attn_h.astype(attn_ref.dtype)

        # attn dropout: identity in eval.
        oh = jnp.dot(attn_h.astype(jnp.bfloat16), vh,
                     preferred_element_type=jnp.float32)        # (tq, d_v)

        # Per-head slice of the output projection, accumulated into y.
        y = y + jnp.dot(oh.astype(jnp.bfloat16),
                        wfc_bf[h * d_v:(h + 1) * d_v, :],
                        preferred_element_type=jnp.float32)     # (tq, d_model)

    # LayerNorm over d_model (f32 math, EUP rsqrt).
    mean = jnp.mean(y, axis=-1, keepdims=True)
    centered = y - mean
    var = jnp.mean(centered * centered, axis=-1, keepdims=True)
    normed = centered * lax.rsqrt(var + eps)
    out = (normed * gamma_ref[...].astype(jnp.float32)
           + beta_ref[...].astype(jnp.float32))

    o_ref[0] = out.astype(o_ref.dtype)


def multi_head_attention(q, k, v, wq, wk, wv, wfc, gamma, beta,
                         *, n_head, d_k, d_v, eps=1e-6, tq=256,
                         return_attn=True, attn_dtype=jnp.float32):
    """q,k,v: (batch, len, d_model). Weights stored as (in, out) matmul layout."""
    batch, len_q, d_model = q.shape
    len_k = k.shape[1]
    assert v.shape[1] == len_k, "len_k must equal len_v"
    tq = min(tq, len_q)
    assert len_q % tq == 0, "len_q must be divisible by the q tile"
    n_q_tiles = len_q // tq

    gamma2 = gamma.reshape(1, d_model)
    beta2 = beta.reshape(1, d_model)

    kernel = functools.partial(mha_kernel, n_head=n_head, d_k=d_k, d_v=d_v,
                               eps=eps, return_attn=return_attn)

    main_shape = jax.ShapeDtypeStruct((batch, len_q, d_model), q.dtype)
    main_spec = pl.BlockSpec((1, tq, d_model), lambda b, i: (b, i, 0))

    if return_attn:
        out_shape = (main_shape,
                     jax.ShapeDtypeStruct((batch, n_head, len_q, len_k),
                                          attn_dtype))
        out_specs = (main_spec,
                     pl.BlockSpec((1, n_head, tq, len_k),
                                  lambda b, i: (b, 0, i, 0)))
    else:
        out_shape = main_shape
        out_specs = main_spec

    result = pl.pallas_call(
        kernel,
        out_shape=out_shape,
        grid_spec=pltpu.PrefetchScalarGridSpec(
            num_scalar_prefetch=0,
            grid=(batch, n_q_tiles),
            in_specs=[
                pl.BlockSpec((1, tq, d_model), lambda b, i: (b, i, 0)),      # q tile
                pl.BlockSpec((1, len_k, d_model), lambda b, i: (b, 0, 0)),   # k (full)
                pl.BlockSpec((1, len_k, d_model), lambda b, i: (b, 0, 0)),   # v (full)
                pl.BlockSpec((d_model, n_head * d_k), lambda b, i: (0, 0)),  # Wq
                pl.BlockSpec((d_model, n_head * d_k), lambda b, i: (0, 0)),  # Wk
                pl.BlockSpec((d_model, n_head * d_v), lambda b, i: (0, 0)),  # Wv
                pl.BlockSpec((n_head * d_v, d_model), lambda b, i: (0, 0)),  # Wfc
                pl.BlockSpec((1, d_model), lambda b, i: (0, 0)),             # gamma
                pl.BlockSpec((1, d_model), lambda b, i: (0, 0)),             # beta
            ],
            out_specs=out_specs,
            scratch_shapes=[
                pltpu.VMEM((len_k, n_head * d_k), jnp.bfloat16),   # cached K proj
                pltpu.VMEM((len_k, n_head * d_v), jnp.bfloat16),   # cached V proj
            ],
        ),
        # Batch axis stays "parallel" (megacore on v7x); the q-tile axis is
        # "arbitrary" so the cached K/V-projection scratch carries across tiles.
        compiler_params=pltpu.CompilerParams(
            dimension_semantics=("parallel", "arbitrary")),
    )(q, k, v, wq, wk, wv, wfc, gamma2, beta2)

    if return_attn:
        out, attn = result
        return out, attn
    return result, None


def reference(q, k, v, wq, wk, wv, wfc, gamma, beta, n_head, d_k, d_v, eps=1e-6):
    b, lq, dm = q.shape
    lk = k.shape[1]
    residual = q
    qp = (q @ wq).reshape(b, lq, n_head, d_k).transpose(0, 2, 1, 3)
    kp = (k @ wk).reshape(b, lk, n_head, d_k).transpose(0, 2, 1, 3)
    vp = (v @ wv).reshape(b, lk, n_head, d_v).transpose(0, 2, 1, 3)
    scores = jnp.einsum('bhqd,bhkd->bhqk', qp, kp) / (d_k ** 0.5)
    attn = jax.nn.softmax(scores, axis=-1)
    o = jnp.einsum('bhqk,bhkd->bhqd', attn, vp)
    o = o.transpose(0, 2, 1, 3).reshape(b, lq, n_head * d_v)
    y = o @ wfc + residual
    mean = jnp.mean(y, axis=-1, keepdims=True)
    var = jnp.mean((y - mean) ** 2, axis=-1, keepdims=True)
    out = (y - mean) / jnp.sqrt(var + eps) * gamma + beta
    return out, attn


if __name__ == "__main__":
    # Small but lane-dense shapes consistent with the module.
    batch, seq, d_model, n_head, d_k, d_v = 2, 128, 128, 2, 64, 64

    key = jax.random.PRNGKey(0)
    kq, kk, kv, k1, k2, k3, k4 = jax.random.split(key, 7)

    q = jax.random.normal(kq, (batch, seq, d_model), dtype=jnp.float32)
    k = jax.random.normal(kk, (batch, seq, d_model), dtype=jnp.float32)
    v = jax.random.normal(kv, (batch, seq, d_model), dtype=jnp.float32)

    # PyTorch nn.Linear-style uniform init, stored pre-transposed as (in, out).
    lim_in = 1.0 / (d_model ** 0.5)
    lim_fc = 1.0 / ((n_head * d_v) ** 0.5)
    wq = jax.random.uniform(k1, (d_model, n_head * d_k), minval=-lim_in, maxval=lim_in, dtype=jnp.float32)
    wk = jax.random.uniform(k2, (d_model, n_head * d_k), minval=-lim_in, maxval=lim_in, dtype=jnp.float32)
    wv = jax.random.uniform(k3, (d_model, n_head * d_v), minval=-lim_in, maxval=lim_in, dtype=jnp.float32)
    wfc = jax.random.uniform(k4, (n_head * d_v, d_model), minval=-lim_fc, maxval=lim_fc, dtype=jnp.float32)
    gamma = jnp.ones((d_model,), dtype=jnp.float32)
    beta = jnp.zeros((d_model,), dtype=jnp.float32)

    out, attn = multi_head_attention(q, k, v, wq, wk, wv, wfc, gamma, beta,
                                     n_head=n_head, d_k=d_k, d_v=d_v,
                                     return_attn=True)
    out = jax.block_until_ready(out)
    attn = jax.block_until_ready(attn)

    ref_out, ref_attn = reference(q, k, v, wq, wk, wv, wfc, gamma, beta,
                                  n_head, d_k, d_v)

    assert out.shape == (batch, seq, d_model)
    assert attn.shape == (batch, n_head, seq, seq)
    # bf16 MXU operands (f32 accumulation) + approx reciprocal -> tolerances
    # appropriate for bf16 compute.
    assert jnp.allclose(attn, ref_attn, atol=1e-2, rtol=1e-2), "attn mismatch vs reference"
    assert jnp.allclose(out, ref_out, atol=2e-2, rtol=2e-2), "output mismatch vs reference"

    # Also exercise the cheaper path that skips the quadratic attn writeback.
    out_noattn, _ = multi_head_attention(q, k, v, wq, wk, wv, wfc, gamma, beta,
                                         n_head=n_head, d_k=d_k, d_v=d_v,
                                         return_attn=False)
    out_noattn = jax.block_until_ready(out_noattn)
    assert jnp.allclose(out_noattn, out, atol=1e-5, rtol=1e-5), "return_attn=False path mismatch"

    print("KERNEL_OK")
</pallas_src>

<mosaic_0001>
module attributes {stable_mosaic.version = 11 : i64} {
  func.func @mha_kernel(%arg0: i32, %arg1: i32, %arg2: memref<1x128x128xf32, #tpu.memory_space<vmem>>, %arg3: memref<1x128x128xf32, #tpu.memory_space<vmem>>, %arg4: memref<1x128x128xf32, #tpu.memory_space<vmem>>, %arg5: memref<128x128xf32, #tpu.memory_space<vmem>>, %arg6: memref<128x128xf32, #tpu.memory_space<vmem>>, %arg7: memref<128x128xf32, #tpu.memory_space<vmem>>, %arg8: memref<128x128xf32, #tpu.memory_space<vmem>>, %arg9: memref<1x128xf32, #tpu.memory_space<vmem>>, %arg10: memref<1x128xf32, #tpu.memory_space<vmem>>, %arg11: memref<1x128x128xf32, #tpu.memory_space<vmem>>, %arg12: memref<1x2x128x128xf32, #tpu.memory_space<vmem>>, %arg13: memref<128x128xbf16, #tpu.memory_space<vmem>>, %arg14: memref<128x128xbf16, #tpu.memory_space<vmem>>) attributes {dimension_semantics = [#tpu.dimension_semantics<parallel>, #tpu.dimension_semantics<arbitrary>], iteration_bounds = array<i64: 2, 1>, scalar_prefetch = 0 : i64, scratch_operands = 2 : i64, tpu.core_type = #tpu.core_type<tc>, window_params = [{transform_indices = @transform_0, window_bounds = array<i64: 1, 128, 128>}, {transform_indices = @transform_1, window_bounds = array<i64: 1, 128, 128>}, {transform_indices = @transform_2, window_bounds = array<i64: 1, 128, 128>}, {pipeline_mode = #tpu.pipeline_mode<synchronous>, transform_indices = @transform_3, window_bounds = array<i64: 128, 128>}, {pipeline_mode = #tpu.pipeline_mode<synchronous>, transform_indices = @transform_4, window_bounds = array<i64: 128, 128>}, {pipeline_mode = #tpu.pipeline_mode<synchronous>, transform_indices = @transform_5, window_bounds = array<i64: 128, 128>}, {pipeline_mode = #tpu.pipeline_mode<synchronous>, transform_indices = @transform_6, window_bounds = array<i64: 128, 128>}, {pipeline_mode = #tpu.pipeline_mode<synchronous>, transform_indices = @transform_7, window_bounds = array<i64: 1, 128>}, {pipeline_mode = #tpu.pipeline_mode<synchronous>, transform_indices = @transform_8, window_bounds = array<i64: 1, 128>}, {transform_indices = @transform_9, window_bounds = array<i64: 1, 128, 128>}, {transform_indices = @transform_10, window_bounds = array<i64: 1, 2, 128, 128>}]} {
    %c0_i32 = arith.constant 0 : i32
    %0 = arith.cmpi eq, %arg1, %c0_i32 : i32
    %1 = arith.extui %0 : i1 to i32
    %c0_i32_0 = arith.constant 0 : i32
    %2 = arith.cmpi ne, %1, %c0_i32_0 : i32
    scf.if %2 {
      %c0_45 = arith.constant 0 : index
      %c0_46 = arith.constant 0 : index
      %c0_47 = arith.constant 0 : index
      %88 = vector.load %arg3[%c0_45, %c0_46, %c0_47] : memref<1x128x128xf32, #tpu.memory_space<vmem>>, vector<1x128x128xf32>
      %89 = vector.shape_cast %88 : vector<1x128x128xf32> to vector<128x128xf32>
      %90 = arith.truncf %89 : vector<128x128xf32> to vector<128x128xbf16>
      %c0_48 = arith.constant 0 : index
      %c0_49 = arith.constant 0 : index
      %c0_50 = arith.constant 0 : index
      %91 = vector.load %arg4[%c0_48, %c0_49, %c0_50] : memref<1x128x128xf32, #tpu.memory_space<vmem>>, vector<1x128x128xf32>
      %92 = vector.shape_cast %91 : vector<1x128x128xf32> to vector<128x128xf32>
      %93 = arith.truncf %92 : vector<128x128xf32> to vector<128x128xbf16>
      %c0_51 = arith.constant 0 : index
      %c0_52 = arith.constant 0 : index
      %94 = vector.load %arg6[%c0_51, %c0_52] : memref<128x128xf32, #tpu.memory_space<vmem>>, vector<128x128xf32>
      %95 = arith.truncf %94 : vector<128x128xf32> to vector<128x128xbf16>
      %cst_53 = arith.constant dense<0.000000e+00> : vector<128x128xf32>
      %96 = tpu.matmul %90, %95, %cst_53 {dimension_numbers = #tpu.dot_dimension_numbers<[1], [0], [0], [1], [0, 0, 1, 1], [], []>} : vector<128x128xbf16>, vector<128x128xbf16>, vector<128x128xf32> -> vector<128x128xf32>
      %97 = arith.truncf %96 : vector<128x128xf32> to vector<128x128xbf16>
      %c0_54 = arith.constant 0 : index
      %c0_55 = arith.constant 0 : index
      %98 = vector.load %arg13[%c0_54, %c0_55] : memref<128x128xbf16, #tpu.memory_space<vmem>>, vector<128x128xbf16>
      tpu.vector_store %arg13[%c0_54, %c0_55], %97 {strides = array<i32>} : memref<128x128xbf16, #tpu.memory_space<vmem>>, vector<128x128xbf16>,
      %c0_56 = arith.constant 0 : index
      %c0_57 = arith.constant 0 : index
      %99 = vector.load %arg7[%c0_56, %c0_57] : memref<128x128xf32, #tpu.memory_space<vmem>>, vector<128x128xf32>
      %100 = arith.truncf %99 : vector<128x128xf32> to vector<128x128xbf16>
      %cst_58 = arith.constant dense<0.000000e+00> : vector<128x128xf32>
      %101 = tpu.matmul %93, %100, %cst_58 {dimension_numbers = #tpu.dot_dimension_numbers<[1], [0], [0], [1], [0, 0, 1, 1], [], []>} : vector<128x128xbf16>, vector<128x128xbf16>, vector<128x128xf32> -> vector<128x128xf32>
      %102 = arith.truncf %101 : vector<128x128xf32> to vector<128x128xbf16>
      %c0_59 = arith.constant 0 : index
      %c0_60 = arith.constant 0 : index
      %103 = vector.load %arg14[%c0_59, %c0_60] : memref<128x128xbf16, #tpu.memory_space<vmem>>, vector<128x128xbf16>
      tpu.vector_store %arg14[%c0_59, %c0_60], %102 {strides = array<i32>} : memref<128x128xbf16, #tpu.memory_space<vmem>>, vector<128x128xbf16>,
    } else {
    }
    %c0 = arith.constant 0 : index
    %c0_1 = arith.constant 0 : index
    %c0_2 = arith.constant 0 : index
    %3 = vector.load %arg2[%c0, %c0_1, %c0_2] : memref<1x128x128xf32, #tpu.memory_space<vmem>>, vector<1x128x128xf32>
    %4 = vector.shape_cast %3 : vector<1x128x128xf32> to vector<128x128xf32>
    %5 = arith.truncf %4 : vector<128x128xf32> to vector<128x128xbf16>
    %c0_3 = arith.constant 0 : index
    %c0_4 = arith.constant 0 : index
    %6 = vector.load %arg5[%c0_3, %c0_4] : memref<128x128xf32, #tpu.memory_space<vmem>>, vector<128x128xf32>
    %7 = arith.truncf %6 : vector<128x128xf32> to vector<128x128xbf16>
    %cst = arith.constant dense<0.000000e+00> : vector<128x128xf32>
    %8 = tpu.matmul %5, %7, %cst {dimension_numbers = #tpu.dot_dimension_numbers<[1], [0], [0], [1], [0, 0, 1, 1], [], []>} : vector<128x128xbf16>, vector<128x128xbf16>, vector<128x128xf32> -> vector<128x128xf32>
    %c0_5 = arith.constant 0 : index
    %c0_6 = arith.constant 0 : index
    %9 = vector.load %arg8[%c0_5, %c0_6] : memref<128x128xf32, #tpu.memory_space<vmem>>, vector<128x128xf32>
    %10 = arith.truncf %9 : vector<128x128xf32> to vector<128x128xbf16>
    %11 = vector.extract_strided_slice %8 {offsets = [0, 0], sizes = [128, 64], strides = [1, 1]} : vector<128x128xf32> to vector<128x64xf32>
    %cst_7 = arith.constant 1.250000e-01 : f32
    %12 = vector.broadcast %cst_7 : f32 to vector<128x64xf32>
    %13 = arith.mulf %11, %12 : vector<128x64xf32>
    %14 = arith.truncf %13 : vector<128x64xf32> to vector<128x64xbf16>
    %c0_8 = arith.constant 0 : index
    %c0_9 = arith.constant 0 : index
    %15 = vector.load %arg13[%c0_8, %c0_9] : memref<128x128xbf16, #tpu.memory_space<vmem>>, vector<128x64xbf16>
    %c0_10 = arith.constant 0 : index
    %c0_11 = arith.constant 0 : index
    %16 = vector.load %arg14[%c0_10, %c0_11] : memref<128x128xbf16, #tpu.memory_space<vmem>>, vector<128x64xbf16>
    %cst_12 = arith.constant dense<0.000000e+00> : vector<128x128xf32>
    %17 = tpu.matmul %14, %15, %cst_12 {dimension_numbers = #tpu.dot_dimension_numbers<[1], [1], [0], [0], [0, 0, 1, 0], [], []>} : vector<128x64xbf16>, vector<128x64xbf16>, vector<128x128xf32> -> vector<128x128xf32>
    %cst_13 = arith.constant dense<0xFF800000> : vector<128xf32>
    %18 = vector.multi_reduction <maximumf>, %17, %cst_13 [1] : vector<128x128xf32> to vector<128xf32>
    %19 = vector.shape_cast %18 : vector<128xf32> to vector<128x1xf32>
    %20 = vector.broadcast %19 : vector<128x1xf32> to vector<128x128xf32>
    %21 = arith.subf %17, %20 : vector<128x128xf32>
    %22 = math.exp %21 : vector<128x128xf32>
    %cst_14 = arith.constant dense<0.000000e+00> : vector<128xf32>
    %23 = vector.multi_reduction <add>, %22, %cst_14 [1] : vector<128x128xf32> to vector<128xf32>
    %24 = vector.shape_cast %23 : vector<128xf32> to vector<128x1xf32>
    %25 = tpu.reciprocal %24 {approx = true} : vector<128x1xf32> -> vector<128x1xf32>
    %26 = vector.broadcast %25 : vector<128x1xf32> to vector<128x128xf32>
    %27 = arith.mulf %22, %26 : vector<128x128xf32>
    %c0_15 = arith.constant 0 : index
    %c0_16 = arith.constant 0 : index
    %c0_17 = arith.constant 0 : index
    %c0_18 = arith.constant 0 : index
    %28 = vector.load %arg12[%c0_15, %c0_16, %c0_17, %c0_18] : memref<1x2x128x128xf32, #tpu.memory_space<vmem>>, vector<1x1x128x128xf32>
    %29 = vector.shape_cast %28 : vector<1x1x128x128xf32> to vector<128x128xf32>
    %30 = vector.shape_cast %27 : vector<128x128xf32> to vector<1x1x128x128xf32>
    tpu.vector_store %arg12[%c0_15, %c0_16, %c0_17, %c0_18], %30 {strides = array<i32>} : memref<1x2x128x128xf32, #tpu.memory_space<vmem>>, vector<1x1x128x128xf32>,
    %31 = arith.truncf %27 : vector<128x128xf32> to vector<128x128xbf16>
    %cst_19 = arith.constant dense<0.000000e+00> : vector<128x64xf32>
    %32 = tpu.matmul %31, %16, %cst_19 {dimension_numbers = #tpu.dot_dimension_numbers<[1], [0], [0], [1], [0, 0, 1, 1], [], []>} : vector<128x128xbf16>, vector<128x64xbf16>, vector<128x64xf32> -> vector<128x64xf32>
    %33 = arith.truncf %32 : vector<128x64xf32> to vector<128x64xbf16>
    %34 = vector.extract_strided_slice %10 {offsets = [0, 0], sizes = [64, 128], strides = [1, 1]} : vector<128x128xbf16> to vector<64x128xbf16>
    %cst_20 = arith.constant dense<0.000000e+00> : vector<128x128xf32>
    %35 = tpu.matmul %33, %34, %cst_20 {dimension_numbers = #tpu.dot_dimension_numbers<[1], [0], [0], [1], [0, 0, 1, 1], [], []>} : vector<128x64xbf16>, vector<64x128xbf16>, vector<128x128xf32> -> vector<128x128xf32>
    %36 = arith.addf %4, %35 : vector<128x128xf32>
    %37 = vector.extract_strided_slice %8 {offsets = [0, 64], sizes = [128, 64], strides = [1, 1]} : vector<128x128xf32> to vector<128x64xf32>
    %cst_21 = arith.constant 1.250000e-01 : f32
    %38 = vector.broadcast %cst_21 : f32 to vector<128x64xf32>
    %39 = arith.mulf %37, %38 : vector<128x64xf32>
    %40 = arith.truncf %39 : vector<128x64xf32> to vector<128x64xbf16>
    %c0_22 = arith.constant 0 : index
    %c64 = arith.constant 64 : index
    %41 = vector.load %arg13[%c0_22, %c64] : memref<128x128xbf16, #tpu.memory_space<vmem>>, vector<128x64xbf16>
    %c0_23 = arith.constant 0 : index
    %c64_24 = arith.constant 64 : index
    %42 = vector.load %arg14[%c0_23, %c64_24] : memref<128x128xbf16, #tpu.memory_space<vmem>>, vector<128x64xbf16>
    %cst_25 = arith.constant dense<0.000000e+00> : vector<128x128xf32>
    %43 = tpu.matmul %40, %41, %cst_25 {dimension_numbers = #tpu.dot_dimension_numbers<[1], [1], [0], [0], [0, 0, 1, 0], [], []>} : vector<128x64xbf16>, vector<128x64xbf16>, vector<128x128xf32> -> vector<128x128xf32>
    %cst_26 = arith.constant dense<0xFF800000> : vector<128xf32>
    %44 = vector.multi_reduction <maximumf>, %43, %cst_26 [1] : vector<128x128xf32> to vector<128xf32>
    %45 = vector.shape_cast %44 : vector<128xf32> to vector<128x1xf32>
    %46 = vector.broadcast %45 : vector<128x1xf32> to vector<128x128xf32>
    %47 = arith.subf %43, %46 : vector<128x128xf32>
    %48 = math.exp %47 : vector<128x128xf32>
    %cst_27 = arith.constant dense<0.000000e+00> : vector<128xf32>
    %49 = vector.multi_reduction <add>, %48, %cst_27 [1] : vector<128x128xf32> to vector<128xf32>
    %50 = vector.shape_cast %49 : vector<128xf32> to vector<128x1xf32>
    %51 = tpu.reciprocal %50 {approx = true} : vector<128x1xf32> -> vector<128x1xf32>
    %52 = vector.broadcast %51 : vector<128x1xf32> to vector<128x128xf32>
    %53 = arith.mulf %48, %52 : vector<128x128xf32>
    %c0_28 = arith.constant 0 : index
    %c1 = arith.constant 1 : index
    %c0_29 = arith.constant 0 : index
    %c0_30 = arith.constant 0 : index
    %54 = vector.load %arg12[%c0_28, %c1, %c0_29, %c0_30] : memref<1x2x128x128xf32, #tpu.memory_space<vmem>>, vector<1x1x128x128xf32>
    %55 = vector.shape_cast %54 : vector<1x1x128x128xf32> to vector<128x128xf32>
    %56 = vector.shape_cast %53 : vector<128x128xf32> to vector<1x1x128x128xf32>
    tpu.vector_store %arg12[%c0_28, %c1, %c0_29, %c0_30], %56 {strides = array<i32>} : memref<1x2x128x128xf32, #tpu.memory_space<vmem>>, vector<1x1x128x128xf32>,
    %57 = arith.truncf %53 : vector<128x128xf32> to vector<128x128xbf16>
    %cst_31 = arith.constant dense<0.000000e+00> : vector<128x64xf32>
    %58 = tpu.matmul %57, %42, %cst_31 {dimension_numbers = #tpu.dot_dimension_numbers<[1], [0], [0], [1], [0, 0, 1, 1], [], []>} : vector<128x128xbf16>, vector<128x64xbf16>, vector<128x64xf32> -> vector<128x64xf32>
    %59 = arith.truncf %58 : vector<128x64xf32> to vector<128x64xbf16>
    %60 = vector.extract_strided_slice %10 {offsets = [64, 0], sizes = [64, 128], strides = [1, 1]} : vector<128x128xbf16> to vector<64x128xbf16>
    %cst_32 = arith.constant dense<0.000000e+00> : vector<128x128xf32>
    %61 = tpu.matmul %59, %60, %cst_32 {dimension_numbers = #tpu.dot_dimension_numbers<[1], [0], [0], [1], [0, 0, 1, 1], [], []>} : vector<128x64xbf16>, vector<64x128xbf16>, vector<128x128xf32> -> vector<128x128xf32>
    %62 = arith.addf %36, %61 : vector<128x128xf32>
    %cst_33 = arith.constant dense<0.000000e+00> : vector<128xf32>
    %63 = vector.multi_reduction <add>, %62, %cst_33 [1] : vector<128x128xf32> to vector<128xf32>
    %64 = vector.shape_cast %63 : vector<128xf32> to vector<128x1xf32>
    %cst_34 = arith.constant 1.280000e+02 : f32
    %65 = vector.broadcast %cst_34 : f32 to vector<128x1xf32>
    %66 = arith.divf %64, %65 : vector<128x1xf32>
    %67 = vector.broadcast %66 : vector<128x1xf32> to vector<128x128xf32>
    %68 = arith.subf %62, %67 : vector<128x128xf32>
    %69 = arith.mulf %68, %68 : vector<128x128xf32>
    %cst_35 = arith.constant dense<0.000000e+00> : vector<128xf32>
    %70 = vector.multi_reduction <add>, %69, %cst_35 [1] : vector<128x128xf32> to vector<128xf32>
    %71 = vector.shape_cast %70 : vector<128xf32> to vector<128x1xf32>
    %cst_36 = arith.constant 1.280000e+02 : f32
    %72 = vector.broadcast %cst_36 : f32 to vector<128x1xf32>
    %73 = arith.divf %71, %72 : vector<128x1xf32>
    %cst_37 = arith.constant 9.99999997E-7 : f32
    %74 = vector.broadcast %cst_37 : f32 to vector<128x1xf32>
    %75 = arith.addf %73, %74 : vector<128x1xf32>
    %76 = math.rsqrt %75 : vector<128x1xf32>
    %77 = vector.broadcast %76 : vector<128x1xf32> to vector<128x128xf32>
    %78 = arith.mulf %68, %77 : vector<128x128xf32>
    %c0_38 = arith.constant 0 : index
    %c0_39 = arith.constant 0 : index
    %79 = vector.load %arg9[%c0_38, %c0_39] : memref<1x128xf32, #tpu.memory_space<vmem>>, vector<1x128xf32>
    %80 = vector.broadcast %79 : vector<1x128xf32> to vector<128x128xf32>
    %81 = arith.mulf %78, %80 : vector<128x128xf32>
    %c0_40 = arith.constant 0 : index
    %c0_41 = arith.constant 0 : index
    %82 = vector.load %arg10[%c0_40, %c0_41] : memref<1x128xf32, #tpu.memory_space<vmem>>, vector<1x128xf32>
    %83 = vector.broadcast %82 : vector<1x128xf32> to vector<128x128xf32>
    %84 = arith.addf %81, %83 : vector<128x128xf32>
    %c0_42 = arith.constant 0 : index
    %c0_43 = arith.constant 0 : index
    %c0_44 = arith.constant 0 : index
    %85 = vector.load %arg11[%c0_42, %c0_43, %c0_44] : memref<1x128x128xf32, #tpu.memory_space<vmem>>, vector<1x128x128xf32>
    %86 = vector.shape_cast %85 : vector<1x128x128xf32> to vector<128x128xf32>
    %87 = vector.shape_cast %84 : vector<128x128xf32> to vector<1x128x128xf32>
    tpu.vector_store %arg11[%c0_42, %c0_43, %c0_44], %87 {strides = array<i32>} : memref<1x128x128xf32, #tpu.memory_space<vmem>>, vector<1x128x128xf32>,
    return
  }
  func.func @transform_0(%arg0: i32, %arg1: i32) -> (i32, i32, i32) {
    %c0_i32 = arith.constant 0 : i32
    %c0_i32_0 = arith.constant 0 : i32
    return %arg0, %arg1, %c0_i32 : i32, i32, i32
  }
  func.func @transform_1(%arg0: i32, %arg1: i32) -> (i32, i32, i32) {
    %c0_i32 = arith.constant 0 : i32
    %c0_i32_0 = arith.constant 0 : i32
    %c0_i32_1 = arith.constant 0 : i32
    return %arg0, %c0_i32, %c0_i32_0 : i32, i32, i32
  }
  func.func @transform_2(%arg0: i32, %arg1: i32) -> (i32, i32, i32) {
    %c0_i32 = arith.constant 0 : i32
    %c0_i32_0 = arith.constant 0 : i32
    %c0_i32_1 = arith.constant 0 : i32
    return %arg0, %c0_i32, %c0_i32_0 : i32, i32, i32
  }
  func.func @transform_3(%arg0: i32, %arg1: i32) -> (i32, i32) {
    %c0_i32 = arith.constant 0 : i32
    %c0_i32_0 = arith.constant 0 : i32
    %c0_i32_1 = arith.constant 0 : i32
    return %c0_i32, %c0_i32_0 : i32, i32
  }
  func.func @transform_4(%arg0: i32, %arg1: i32) -> (i32, i32) {
    %c0_i32 = arith.constant 0 : i32
    %c0_i32_0 = arith.constant 0 : i32
    %c0_i32_1 = arith.constant 0 : i32
    return %c0_i32, %c0_i32_0 : i32, i32
  }
  func.func @transform_5(%arg0: i32, %arg1: i32) -> (i32, i32) {
    %c0_i32 = arith.constant 0 : i32
    %c0_i32_0 = arith.constant 0 : i32
    %c0_i32_1 = arith.constant 0 : i32
    return %c0_i32, %c0_i32_0 : i32, i32
  }
  func.func @transform_6(%arg0: i32, %arg1: i32) -> (i32, i32) {
    %c0_i32 = arith.constant 0 : i32
    %c0_i32_0 = arith.constant 0 : i32
    %c0_i32_1 = arith.constant 0 : i32
    return %c0_i32, %c0_i32_0 : i32, i32
  }
  func.func @transform_7(%arg0: i32, %arg1: i32) -> (i32, i32) {
    %c0_i32 = arith.constant 0 : i32
    %c0_i32_0 = arith.constant 0 : i32
    %c0_i32_1 = arith.constant 0 : i32
    return %c0_i32, %c0_i32_0 : i32, i32
  }
  func.func @transform_8(%arg0: i32, %arg1: i32) -> (i32, i32) {
    %c0_i32 = arith.constant 0 : i32
    %c0_i32_0 = arith.constant 0 : i32
    %c0_i32_1 = arith.constant 0 : i32
    return %c0_i32, %c0_i32_0 : i32, i32
  }
  func.func @transform_9(%arg0: i32, %arg1: i32) -> (i32, i32, i32) {
    %c0_i32 = arith.constant 0 : i32
    %c0_i32_0 = arith.constant 0 : i32
    return %arg0, %arg1, %c0_i32 : i32, i32, i32
  }
  func.func @transform_10(%arg0: i32, %arg1: i32) -> (i32, i32, i32, i32) {
    %c0_i32 = arith.constant 0 : i32
    %c0_i32_0 = arith.constant 0 : i32
    %c0_i32_1 = arith.constant 0 : i32
    return %arg0, %c0_i32, %arg1, %c0_i32_0 : i32, i32, i32, i32
  }
}

</mosaic_0001>

<bundles_post_ra>
// kernel: tpu_custom_call.1
= control target key start
LH: loop header
LB: loop body
LE: loop exit
PB: predicated region body
PF: predicated region fallthrough
CT: control target
= control target key end

     0   :  { %s5170_s0 = inlined_call_operand.hbm [shape: f32[2,128,128], index: 0, kind: input, shape index: {}]   ;;  %s5171_s1 = inlined_call_operand.hbm [shape: f32[2,128,128], index: 1, kind: input, shape index: {}]   ;;  %s5172_s2 = inlined_call_operand.hbm [shape: f32[2,128,128], index: 2, kind: input, shape index: {}]   ;;  %s5173_s3 = inlined_call_operand.hbm [shape: f32[128,128], index: 3, kind: input, shape index: {}]   ;;  %s5174_s4 = inlined_call_operand.hbm [shape: f32[128,128], index: 4, kind: input, shape index: {}]   ;;  %s5175_s5 = inlined_call_operand.hbm [shape: f32[128,128], index: 5, kind: input, shape index: {}]   ;;  %s5176_s6 = inlined_call_operand.hbm [shape: f32[128,128], index: 6, kind: input, shape index: {}]   ;;  %s5177_s7 = inlined_call_operand.vmem [shape: f32[1,128], index: 7, kind: input, shape index: {}]   ;;  %s5178_s8 = inlined_call_operand.vmem [shape: f32[1,128], index: 8, kind: input, shape index: {}]   ;;  %s5179_s9 = inlined_call_operand.hbm [shape: f32[2,128,128], index: 9, kind: output, shape index: {0}]   ;;  %s5180_s10 = inlined_call_operand.hbm [shape: f32[2,2,128,128], index: 10, kind: output, shape index: {1}]  }
   0x1   :  { %5209 = sst [smem:[#allocation33_spill]] %s5171_s1 }
   0x2   :  { %5210 = sst [smem:[#allocation34_spill]] %s5173_s3 }
   0x3   :  { %5211 = sst [smem:[#allocation35_spill]] %s5175_s5 }
   0x4   :  { %5212 = sst [smem:[#allocation36_spill]] %s5177_s7 }
   0x5   :  { %5213 = sst [smem:[#allocation37_spill]] %s5178_s8 }
   0x6   :  { %5214 = sst [smem:[#allocation38_spill]] %s5179_s9 }
   0x7   :  { %5215 = sst [smem:[#allocation39_spill]] %s5180_s10 }
   0x8   :  { %16 = vsyncpa [#allocation5], 0 }
   0x9   :  { %18 = vsyncpa [#allocation5 + $0x1], 0 }
   0xa   :  { %19 = vsyncpa [#allocation8], 0 }
   0xb   :  { %21 = vsyncpa [#allocation8 + $0x1], 0 }
   0xc   :  { %22 = vsyncpa [#allocation11], 0 }
   0xd   :  { %23 = vsyncpa [#allocation14], 0 }
   0xe   :  { %24 = vsyncpa [#allocation6], 0 }
   0xf   :  { %26 = vsyncpa [#allocation6 + $0x1], 0 }
  0x10   :  { %27 = vsyncpa [#allocation18], 0 }
  0x11   :  { %29 = vsyncpa [#allocation18 + $0x1], 0  ;;  %s4032_s13 = smov 0   ;;  %s4034_s14 = smov 0  }
  0x12   :  { %s4036_s15 = smov 0   ;;  %s4038_s16 = smov 0  }
  0x13   :  { %s4040_s17 = smov 0   ;;  %s4042_s18 = smov 0  }
  0x14 LB: > { %5216 = sst [smem:[#allocation25_spill]] %s3941_s13  ;;  %s4063_s19 = sadd.s32 4294967295, %s3961_s18   ;;  %s3961_s18 = sphi %s4042_s18, %s35_s18   ;;  %s3957_s17 = sphi %s4040_s17, %s5265_s17   ;;  %s3953_s16 = sphi %s4038_s16, %s5264_s16   ;;  %s3949_s15 = sphi %s4036_s15, %s5268_s15   ;;  %s3945_s14 = sphi %s4034_s14, %s5267_s14   ;;  %s3941_s13 = sphi %s4032_s13, %s5266_s13  }
  0x15   : > { %5217 = sst [smem:[#allocation26_spill]] %s3953_s16  ;;  %s2773_s20 = sadd.s32 4294967294, %s3961_s18  }
  0x16   : > { %5218 = sst [smem:[#allocation27_spill]] %s3957_s17  ;;  %p69_p0 = scmp.ne.s32.totalorder %s3945_s14, %s3941_s13 }
  0x17   : > { %5219 = sst [smem:[#allocation28_spill]] %s3961_s18  ;;  %p5182_p1 = scmp.eq.s32.totalorder %s4063_s19, 0 }
  0x18   : > { %p279_p3 = scmp.eq.s32.totalorder %s2773_s20, 1  ;;  %p2774_p5 = scmp.ge.s32.totalorder %s3961_s18, 1 }
  0x19   : > { %p4072_p4 = por %p5182_p1, %p69_p0  ;;  %p314_p7 = scmp.lt.s32.totalorder %s3961_s18, 3 }
  0x1a   : > { %p4077_p6 = por %p279_p3, %p69_p0  ;;  %s3963_s24 = smov [#allocation10]  }
  0x1b   : > { %s5220_s21 = scalar_select %p4072_p4, 1, 0 }
  0x1c   : > { %s5221_s22 = scalar_select %p4077_p6, 1, 0 }
  0x1d   : > { %p4082_p8 = pnand %p2774_p5, %p314_p7  ;;  %s326_s25 = sshll.u32 %s3963_s24, 4  ;;  %s4086_s25 = int_to_ptr.vmem [resolvable:$true] %s326_s25 }
  0x1e   : > { %5222 = sst [smem:[#allocation29_spill]] %s5221_s22  ;;  %s3964_s27 = smov [#allocation13]  }
  0x1f   : > { %s5223_s23 = scalar_select %p4082_p8, 1, 0 }
  0x20   : > { %p3360_p9 = pneg %p4082_p8  ;;  %s352_s28 = sshll.u32 %s3964_s27, 4  ;;  %s4097_s28 = int_to_ptr.vmem [resolvable:$true] %s352_s28 }
  0x21   : > { %s5225_s3 = sld [smem:[#allocation34_spill]] }
  0x22   : > { %p4093_p11 = pnand %p3360_p9, %p5182_p1 }
  0x24   : > { %s5224_s26 = scalar_select %p4093_p11, 1, 0 }
  0x25   : > { %p4107_p13 = pneg %p4093_p11 }
  0x27   : > { %s3633_s11 = scalar_lea.hbm %s5225_s3, 2048 }
  0x28   : > { %p3634_p12 = scmp.ne.s32.totalorder %s5225_s3, %s3633_s11  ;;  %p3640_p5 = scmp.lt.u32.totalorder %s3633_s11, %s5225_s3 }
  0x29   : > { %s5226_s24 = scalar_select %p4107_p13, 1, 0 }
  0x2a   : > { %p3636_p0 = pnand %p4107_p13, %p3634_p12 }
  0x2c   : > { %p3637_p3 = pneg %p3636_p0 }
  0x2e   : > { %p3642_p7 = pnand %p3640_p5, %p3637_p3 }
  0x30   : > { %3645 = shalt.err (!%p3642_p7)
}
  0x31   : > { %s3646_s29 = scalar_lea.vmem %s4086_s25, 2048  ;;  %p3654_p2 = scmp.lt.s32.totalorder %s4086_s25, %s4086_s25 }
  0x32   : > { %p3647_p9 = scmp.ne.s32.totalorder %s4086_s25, %s3646_s29  ;;  %p3655_p6 = scmp.lt.s32.totalorder %s3646_s29, %s3646_s29 }
  0x34   : > { %p3649_p10 = pnand %p3647_p9, %p4107_p13  ;;  %p3656_p12 = por %p3655_p6, %p3654_p2 }
  0x36   : > { %p3650_p1 = pneg %p3649_p10 }
  0x38   : > { %p3657_p0 = pnand %p3656_p12, %p3650_p1 }
  0x3a   : > { %3660 = shalt.err (!%p3657_p0)
}
  0x3b   : > { %s5185_s30 = smov 128   ;;  %s5187_s22 = smov 8  }
  0x3c   : > { %3363 = dma.hbm_to_vmem [thread:$0]  (!%p4093_p11), %s5225_s3, 2048, %s4086_s25, [#allocation11], %s5185_s30, %s5185_s30, %s5187_s22  }
  0x3d   : > { %s5227_s5 = sld [smem:[#allocation35_spill]] }
  0x43   : > { %s3661_s29 = scalar_lea.hbm %s5227_s5, 2048 }
  0x44   : > { %p3662_p1 = scmp.ne.s32.totalorder %s5227_s5, %s3661_s29  ;;  %p3668_p10 = scmp.lt.u32.totalorder %s3661_s29, %s5227_s5 }
  0x46   : > { %p3664_p2 = pnand %p3662_p1, %p4107_p13 }
  0x48   : > { %p3665_p6 = pneg %p3664_p2 }
  0x4a   : > { %p3670_p3 = pnand %p3668_p10, %p3665_p6 }
  0x4c   : > { %3673 = shalt.err (!%p3670_p3)
}
  0x4d   : > { %s3674_s25 = scalar_lea.vmem %s4097_s28, 2048  ;;  %p3682_p12 = scmp.lt.s32.totalorder %s4097_s28, %s4097_s28 }
  0x4e   : > { %p3675_p5 = scmp.ne.s32.totalorder %s4097_s28, %s3674_s25  ;;  %p3683_p0 = scmp.lt.s32.totalorder %s3674_s25, %s3674_s25 }
  0x50   : > { %p3677_p7 = pnand %p3675_p5, %p4107_p13  ;;  %p3684_p1 = por %p3683_p0, %p3682_p12 }
  0x52   : > { %p3678_p9 = pneg %p3677_p7 }
  0x54   : > { %p3685_p2 = pnand %p3684_p1, %p3678_p9 }
  0x56   : > { %3688 = shalt.err (!%p3685_p2)
}
  0x57   : > { %3369 = dma.hbm_to_vmem [thread:$0]  (!%p4093_p11), %s5227_s5, 2048, %s4097_s28, [#allocation14], %s5185_s30, %s5185_s30, %s5187_s22  }
  0x58   : > { %s47_s9 = sadd.s32 1, %s3957_s17  ;;  %s56_s13 = sadd.s32 1, %s3949_s15 }
  0x59   : > { %p49_p6 = scmp.ge.s32.totalorder %s47_s9, 2  ;;  %p63_p10 = scmp.ne.s32.totalorder %s3949_s15, %s3945_s14 }
  0x5a   : > { %p64_p3 = scmp.eq.s32.totalorder %s3961_s18, 0  ;;  %p3394_p5 = scmp.lt.s32.totalorder %s3961_s18, 2 }
  0x5b   : > { %s5270_s9 = smov (%p49_p6, %s47_s9), 0  ;;  %p5229_p9 = scmp.eq.s32.totalorder %s4063_s19, 1 }
  0x5c   : > { %5228 = sst [smem:[#allocation30_spill]] %s5270_s9  ;;  %p65_p7 = por %p64_p3, %p63_p10 }
  0x5d   : > { %p4167_p12 = por %p5229_p9, %p63_p10  ;;  %s51_s12 = ssub.s32 %s3957_s17, %s5270_s9 }
  0x5e   : > { %s5189_s20 = sand.u32 1, %s3949_s15   ;;  %p54_p0 = scmp.eq.s32.totalorder %s51_s12, 0 }
  0x5f   : > { %s5230_s11 = scalar_select %p4167_p12, 1, 0 }
  0x60   : > { %s4176_s28 = sshll.u32 %s5189_s20, 7  ;;  %s4179_s27 = sshll.u32 %s3957_s17, 11 }
  0x61   : > { %5231 = sst [smem:[#allocation31_spill]] %s5230_s11  ;;  %p4181_p1 = pnand %p3394_p5, %p65_p7 }
  0x62   : > { %s4186_s25 = scalar_select %p54_p0, %s3949_s15, %s56_s13  }
  0x63   : > { %s5232_s29 = scalar_select %p4181_p1, 1, 0 }
  0x64   : > { %5233 = sst [smem:[#allocation32_spill]] %s4186_s25  ;;  %s408_s7 = sand.u32 1, %s3961_s18  }
  0x65   : > { %s5234_s1 = sld [smem:[#allocation33_spill]]  ;;  %s412_s12 = scalar_lea.vmem [#allocation7], %s4176_s28 }
  0x66   : > { %s419_s20 = sshll.u32 %s412_s12, 4  ;;  %s4198_s3 = scalar_lea.sflag [#allocation8], %s408_s7  ;;  %s4196_s20 = int_to_ptr.vmem [resolvable:$true] %s419_s20 }
  0x67   : > { %p4204_p6 = pneg %p4181_p1 }
  0x69   : > { %s5235_s13 = scalar_select %p4204_p6, 1, 0 }
  0x6b   : > { %s4193_s22 = scalar_lea.hbm %s5234_s1, %s4179_s27  ;;  %s3694_s9 = scalar_lea.hbm %s5234_s1, 4096 }
  0x6c   : > { %s3689_s5 = scalar_lea.hbm %s4193_s22, 2048  ;;  %p3695_p5 = scmp.lt.u32.totalorder %s4193_s22, %s5234_s1 }
  0x6d   : > { %p3690_p2 = scmp.ne.s32.totalorder %s4193_s22, %s3689_s5  ;;  %p3696_p7 = scmp.lt.u32.totalorder %s3694_s9, %s3689_s5 }
  0x6e   : > { %p3698_p0 = scmp.lt.u32.totalorder %s3689_s5, %s4193_s22 }
  0x6f   : > { %p3692_p10 = pnand %p4204_p6, %p3690_p2  ;;  %p3697_p9 = por %p3696_p7, %p3695_p5 }
  0x71   : > { %p3693_p3 = pneg %p3692_p10  ;;  %p3699_p12 = por %p3698_p0, %p3697_p9 }
  0x73   : > { %p3700_p4 = pnand %p3699_p12, %p3693_p3 }
  0x75   : > { %3703 = shalt.err (!%p3700_p4)
}
  0x76   : > { %s3704_s7 = scalar_lea.vmem %s4196_s20, 2048  ;;  %s3967_s30 = smov [#allocation7]  }
  0x77   : > { %p3705_p2 = scmp.ne.s32.totalorder %s4196_s20, %s3704_s7  ;;  %s3709_s8 = sshll.u32 %s3967_s30, 4  ;;  %s3710_s8 = int_to_ptr.vmem [resolvable:$false] %s3709_s8 }
  0x78   : > { %s3711_s17 = scalar_lea.vmem %s3710_s8, 4096  ;;  %p3712_p11 = scmp.lt.s32.totalorder %s4196_s20, %s3710_s8 }
  0x79   : > { %p3707_p10 = pnand %p3705_p2, %p4204_p6  ;;  %p3713_p13 = scmp.lt.s32.totalorder %s3711_s17, %s3704_s7 }
  0x7b   : > { %p3708_p8 = pneg %p3707_p10  ;;  %p3714_p5 = por %p3713_p13, %p3712_p11 }
  0x7d   : > { %p3715_p7 = pnand %p3714_p5, %p3708_p8 }
  0x7f   : > { %3718 = shalt.err (!%p3715_p7)
}
  0x80   : > { %s5236_s5 = smov 8   ;;  %s5237_s9 = smov 128  }
  0x81   : > { %3379 = dma.hbm_to_vmem [thread:$0]  (!%p4181_p1), %s4193_s22, 2048, %s4196_s20, %s4198_s3, %s5237_s9, %s5237_s9, %s5236_s5  }
  0x82   : > { %s3968_s12 = smov [#allocation12]   ;;  %s3969_s30 = smov [#allocation15]  }
  0x83   : > { %s339_s1 = sshll.u32 %s3968_s12, 4  ;;  %s365_s25 = sshll.u32 %s3969_s30, 4  ;;  %s340_s1 = int_to_ptr.vmem [resolvable:$true] %s339_s1  ;;  %s366_s25 = int_to_ptr.vmem [resolvable:$true] %s365_s25 }
  0x84   : > { %s3719_s17 = scalar_lea.hbm %s5174_s4, 2048  ;;  %p5238_p8 = scmp.ne.s32.totalorder %s5226_s24, 0 }
  0x85   : > { %p3720_p4 = scmp.ne.s32.totalorder %s5174_s4, %s3719_s17  ;;  %p3726_p12 = scmp.lt.u32.totalorder %s3719_s17, %s5174_s4 }
  0x87   : > { %p3722_p11 = pnand %p3720_p4, %p5238_p8 }
  0x89   : > { %p3723_p13 = pneg %p3722_p11 }
  0x8b   : > { %p3728_p3 = pnand %p3726_p12, %p3723_p13 }
  0x8d   : > { %3731 = shalt.err (!%p3728_p3)
}
  0x8e   : > { %s3732_s22 = scalar_lea.vmem %s340_s1, 2048  ;;  %p3740_p10 = scmp.lt.s32.totalorder %s340_s1, %s340_s1 }
  0x8f   : > { %p3733_p9 = scmp.ne.s32.totalorder %s340_s1, %s3732_s22  ;;  %p3741_p5 = scmp.lt.s32.totalorder %s3732_s22, %s3732_s22 }
  0x91   : > { %p3735_p0 = pnand %p3733_p9, %p5238_p8  ;;  %p3742_p7 = por %p3741_p5, %p3740_p10 }
  0x93   : > { %p3736_p2 = pneg %p3735_p0 }
  0x95   : > { %p3743_p1 = pnand %p3742_p7, %p3736_p2 }
  0x97   : > { %3746 = shalt.err (!%p3743_p1)
}
  0x98   : > { %p5239_p4 = scmp.ne.s32.totalorder %s5224_s26, 0  ;;  %s3747_s20 = scalar_lea.hbm %s5176_s6, 2048 }
  0x99   : > { %p3748_p11 = scmp.ne.s32.totalorder %s5176_s6, %s3747_s20  ;;  %p3754_p12 = scmp.lt.u32.totalorder %s3747_s20, %s5176_s6 }
  0x9a   : > { %3366 = dma.hbm_to_vmem [thread:$0]  (!%p5239_p4), %s5174_s4, 2048, %s340_s1, [#allocation11], %s5237_s9, %s5237_s9, %s5236_s5  }
  0x9b   : > { %p3750_p1 = pnand %p3748_p11, %p5238_p8 }
  0x9d   : > { %p3751_p13 = pneg %p3750_p1 }
  0x9f   : > { %p3756_p3 = pnand %p3754_p12, %p3751_p13 }
  0xa1   : > { %3759 = shalt.err (!%p3756_p3)
}
  0xa2   : > { %s3760_s17 = scalar_lea.vmem %s366_s25, 2048  ;;  %p3768_p10 = scmp.lt.s32.totalorder %s366_s25, %s366_s25 }
  0xa3   : > { %p3761_p9 = scmp.ne.s32.totalorder %s366_s25, %s3760_s17  ;;  %p3769_p5 = scmp.lt.s32.totalorder %s3760_s17, %s3760_s17 }
  0xa5   : > { %p3763_p0 = pnand %p3761_p9, %p5238_p8  ;;  %p3770_p7 = por %p3769_p5, %p3768_p10 }
  0xa7   : > { %p3764_p2 = pneg %p3763_p0 }
  0xa9   : > { %p3771_p6 = pnand %p3770_p7, %p3764_p2 }
  0xab   : > { %3774 = shalt.err (!%p3771_p6)
}
  0xac   : > { %3372 = dma.hbm_to_vmem [thread:$0]  (!%p5239_p4), %s5176_s6, 2048, %s366_s25, [#allocation14], %s5237_s9, %s5237_s9, %s5236_s5  }
  0xad   : > { %s4277_s16 = scalar_lea.hbm %s5170_s0, %s4179_s27  ;;  %s389_s26 = scalar_lea.vmem [#allocation4], %s4176_s28 }
  0xae   : > { %s398_s18 = sshll.u32 %s389_s26, 4  ;;  %s4286_s12 = scalar_lea.hbm %s5172_s2, %s4179_s27  ;;  %s4280_s18 = int_to_ptr.vmem [resolvable:$true] %s398_s18 }
  0xaf   : > { %s5240_s30 = sand.u32 1, %s3949_s15   ;;  %s3775_s8 = scalar_lea.hbm %s4277_s16, 2048 }
  0xb0   : > { %s4290_s25 = scalar_lea.sflag [#allocation5], %s5240_s30  ;;  %p3776_p6 = scmp.ne.s32.totalorder %s4277_s16, %s3775_s8 }
  0xb1   : > { %p5241_p8 = scmp.ne.s32.totalorder %s5235_s13, 0  ;;  %s3780_s1 = scalar_lea.hbm %s5170_s0, 4096 }
  0xb2   : > { %p3781_p1 = scmp.lt.u32.totalorder %s4277_s16, %s5170_s0  ;;  %p3782_p13 = scmp.lt.u32.totalorder %s3780_s1, %s3775_s8 }
  0xb3   : > { %p3778_p4 = pnand %p3776_p6, %p5241_p8  ;;  %p3784_p3 = scmp.lt.u32.totalorder %s3775_s8, %s4277_s16 }
  0xb4   : > { %p3783_p12 = por %p3782_p13, %p3781_p1 }
  0xb5   : > { %p3779_p11 = pneg %p3778_p4 }
  0xb6   : > { %p3785_p9 = por %p3784_p3, %p3783_p12 }
  0xb8   : > { %p3786_p0 = pnand %p3785_p9, %p3779_p11 }
  0xba   : > { %3789 = shalt.err (!%p3786_p0)
}
  0xbb   : > { %s3790_s27 = scalar_lea.vmem %s4280_s18, 2048  ;;  %s3970_s10 = smov [#allocation4]  }
  0xbc   : > { %p3791_p2 = scmp.ne.s32.totalorder %s4280_s18, %s3790_s27  ;;  %s3795_s26 = sshll.u32 %s3970_s10, 4  ;;  %s3796_s26 = int_to_ptr.vmem [resolvable:$false] %s3795_s26 }
  0xbd   : > { %s3797_s11 = scalar_lea.vmem %s3796_s26, 4096  ;;  %p3798_p7 = scmp.lt.s32.totalorder %s4280_s18, %s3796_s26 }
  0xbe   : > { %p3793_p10 = pnand %p3791_p2, %p5241_p8  ;;  %p3799_p6 = scmp.lt.s32.totalorder %s3797_s11, %s3790_s27 }
  0xc0   : > { %p3794_p5 = pneg %p3793_p10  ;;  %p3800_p4 = por %p3799_p6, %p3798_p7 }
  0xc2   : > { %p3801_p1 = pnand %p3800_p4, %p3794_p5 }
  0xc4   : > { %3804 = shalt.err (!%p3801_p1)
}
  0xc5   : > { %p5242_p11 = scmp.ne.s32.totalorder %s5232_s29, 0  ;;  %s433_s20 = scalar_lea.vmem [#allocation9], %s4176_s28 }
  0xc6   : > { %s440_s30 = sshll.u32 %s433_s20, 4  ;;  %s3805_s8 = scalar_lea.hbm %s4286_s12, 2048  ;;  %s4318_s30 = int_to_ptr.vmem [resolvable:$true] %s440_s30 }
  0xc7   : > { %3376 = dma.hbm_to_vmem [thread:$0]  (!%p5242_p11), %s4277_s16, 2048, %s4280_s18, %s4290_s25, %s5237_s9, %s5237_s9, %s5236_s5  }
  0xc8   : > { %p3806_p13 = scmp.ne.s32.totalorder %s4286_s12, %s3805_s8  ;;  %s3810_s1 = scalar_lea.hbm %s5172_s2, 4096 }
  0xc9   : > { %p3811_p9 = scmp.lt.u32.totalorder %s4286_s12, %s5172_s2  ;;  %p3812_p0 = scmp.lt.u32.totalorder %s3810_s1, %s3805_s8 }
  0xca   : > { %p3808_p12 = pnand %p3806_p13, %p5241_p8  ;;  %p3814_p10 = scmp.lt.u32.totalorder %s3805_s8, %s4286_s12 }
  0xcb   : > { %p3813_p2 = por %p3812_p0, %p3811_p9 }
  0xcc   : > { %p3809_p3 = pneg %p3808_p12 }
  0xcd   : > { %p3815_p5 = por %p3814_p10, %p3813_p2 }
  0xcf   : > { %p3816_p7 = pnand %p3815_p5, %p3809_p3 }
  0xd1   : > { %3819 = shalt.err (!%p3816_p7)
}
  0xd2   : > { %s3820_s28 = scalar_lea.vmem %s4318_s30, 2048  ;;  %s3971_s16 = smov [#allocation9]  }
  0xd3   : > { %p3821_p6 = scmp.ne.s32.totalorder %s4318_s30, %s3820_s28  ;;  %s3825_s18 = sshll.u32 %s3971_s16, 4  ;;  %s3826_s18 = int_to_ptr.vmem [resolvable:$false] %s3825_s18 }
  0xd4   : > { %s3827_s25 = scalar_lea.vmem %s3826_s18, 4096  ;;  %p3828_p13 = scmp.lt.s32.totalorder %s4318_s30, %s3826_s18 }
  0xd5   : > { %p3823_p4 = pnand %p3821_p6, %p5241_p8  ;;  %p3829_p12 = scmp.lt.s32.totalorder %s3827_s25, %s3820_s28 }
  0xd7   : > { %p3824_p1 = pneg %p3823_p4  ;;  %p3830_p9 = por %p3829_p12, %p3828_p13 }
  0xd9   : > { %p3831_p0 = pnand %p3830_p9, %p3824_p1 }
  0xdb   : > { %3834 = shalt.err (!%p3831_p0)
}
  0xdc   : > { %3382 = dma.hbm_to_vmem [thread:$0]  (!%p5242_p11), %s4286_s12, 2048, %s4318_s30, %s4198_s3, %s5237_s9, %s5237_s9, %s5236_s5  }
  0xdd   : > { %p5243_p8 = scmp.ne.s32.totalorder %s5223_s23, 0 }
  0xde   : > { %s4348_s13 = sand.u32 (!%p5243_p8), 1, %s3945_s14   ;;  %p5244_p3 = scmp.ne.s32.totalorder (!%p5243_p8), %s5220_s21, 0 }
  0xdf   : > { %452 = sbr.rel (%p5243_p8) target bundleno = 2260 (0x8d4), region = 56  ;;  %s4351_s27 = sshll.u32 (!%p5243_p8), %s4348_s13, 7 }
  0xe0   : > { %s455_s29 = scalar_lea.sflag (!%p5243_p8), [#allocation5], %s4348_s13  ;;  %s4355_s10 = scalar_lea.vmem (!%p5243_p8), [#allocation4], %s4351_s27 }
  0xe6   : > { %3916 = dma.done.wait (%p5244_p3), %s455_s29, 2048  }
  0xe7   : > { %3918 = vsyncadd (%p5244_p3), %s455_s29, 4294965248  ;;  %s463_s3 = sand.u32 1, %s4063_s19   ;;  %s4363_s5 = scalar_lea.vmem [#allocation7], %s4351_s27 }
  0xe8   : > { %s464_s23 = scalar_lea.sflag [#allocation8], %s463_s3 }
  0xe9   : > { %3920 = dma.done.wait (%p5244_p3), %s464_s23, 4096  }
  0xea   : > { %3922 = vsyncadd (%p5244_p3), %s464_s23, 4294963200  ;;  %s4370_s9 = scalar_lea.vmem [#allocation9], %s4351_s27  ;;  %p5245_p11 = scmp.eq.s32.totalorder %s4063_s19, 0 }
  0xec   : > { %3924 = dma.done.wait (%p5245_p11), [#allocation11], 4096   ;;  %p5246_p2 = pmov %p5245_p11 }
  0xee   : > { %3926 = vsyncadd (%p5246_p2), [#allocation11], 4294963200  ;;  %p5247_p10 = pmov %p5246_p2 }
  0xef   : > { %p5248_p5 = pmov %p5246_p2 }
  0xf0   : > { %3928 = dma.done.wait (%p5247_p10), [#allocation14], 4096  }
  0xf1   : > { %3930 = vsyncadd (%p5248_p5), [#allocation14], 4294963200  ;;  %v600_v0 = vld [vmem:[#allocation12] sm:$0xff]  ;;  %v601_v1 = vld [vmem:[#allocation12 + $0x8] sm:$0xff]  ;;  %vm1083_vm0 = vcmask 523264   ;;  %s3972_s19 = smov 64  }
  0xf2   : > { %v602_v2 = vld [vmem:[#allocation12 + $0x10] sm:$0xff]  ;;  %v616_v3 = vpack.c.bf16 %v601_v1, %v600_v0  ;;  %v603_v4 = vld [vmem:[#allocation12 + $0x18] sm:$0xff]  ;;  %v604_v6 = vld [vmem:[#allocation12 + $0x20] sm:$0xff]  ;;  %s2798_s21 = sshll.u32 %s4348_s13, 8  ;;  %s5249_s26 = sld [smem:[#allocation26_spill]] }
  0xf3   : > { %v617_v5 = vpack.c.bf16 %v603_v4, %v602_v2  ;;  %v605_v7 = vld [vmem:[#allocation12 + $0x28] sm:$0xff]  ;;  %v552_v9 = vld [vmem:[%s4363_s5] sm:$0xff]  ;;  %v606_v11 = vld [vmem:[#allocation12 + $0x30] sm:$0xff]  ;;  %s4659_s12 = scalar_lea.vmem [#allocation17], %s2798_s21  ;;  %s5250_s11 = sld [smem:[#allocation31_spill]] }
  0xf4   : > { %2998 = vmatprep.subr.bf16.mxu0 %v616_v3  ;;  %v618_v8 = vpack.c.bf16 %v605_v7, %v604_v6  ;;  %v553_v10 = vld [vmem:[%s4363_s5 + $0x8] sm:$0xff]  ;;  %v607_v12 = vld [vmem:[#allocation12 + $0x38] sm:$0xff]  ;;  %v608_v15 = vld [vmem:[#allocation12 + $0x40] sm:$0xff]  ;;  %s2569_s30 = sshll.u32 %s4659_s12, 4  ;;  %s5251_s17 = sld [smem:[#allocation39_spill]]  ;;  %s5005_s30 = int_to_ptr.vmem [resolvable:$true] %s2569_s30 }
  0xf5   : > { %2999 = vmatpush3.bf16.msra.mxu0 %v616_v3  ;;  %v568_v13 = vpack.c.bf16 %v553_v10, %v552_v9  ;;  %v619_v14 = vpack.c.bf16 %v607_v12, %v606_v11  ;;  %v609_v16 = vld [vmem:[#allocation12 + $0x48] sm:$0xff]  ;;  %v610_v18 = vld [vmem:[#allocation12 + $0x50] sm:$0xff]  ;;  %v611_v19 = vld [vmem:[#allocation12 + $0x58] sm:$0xff]  ;;  %s2536_s24 = scalar_lea.sflag [#allocation18], %s4348_s13  ;;  %s3835_s28 = scalar_lea.vmem %s5005_s30, 4096 }
  0xf6   : > { %3000 = vmatprep.subr.bf16.mxu0 %v617_v5  ;;  %v620_v17 = vpack.c.bf16 %v609_v16, %v608_v15  ;;  %v621_v20 = vpack.c.bf16 %v611_v19, %v610_v18  ;;  %v612_v21 = vld [vmem:[#allocation12 + $0x60] sm:$0xff]  ;;  %v613_v22 = vld [vmem:[#allocation12 + $0x68] sm:$0xff]  ;;  %v614_v24 = vld [vmem:[#allocation12 + $0x70] sm:$0xff]  ;;  %p3836_p7 = scmp.ne.s32.totalorder %s5005_s30, %s3835_s28  ;;  %s3973_s16 = smov [#allocation17]  }
  0xf7   : > { %3014 = vmatprep.mubr.bf16.mxu0 %v568_v13  ;;  %v622_v23 = vpack.c.bf16 %v613_v22, %v612_v21  ;;  %v737_v25 = vld [vmem:[#allocation13] sm:$0xff]  ;;  %v738_v26 = vld [vmem:[#allocation13 + $0x8] sm:$0xff]  ;;  %v615_v27 = vld [vmem:[#allocation12 + $0x78] sm:$0xff]  ;;  %s3839_s18 = sshll.u32 %s3973_s16, 4  ;;  %s3840_s18 = int_to_ptr.vmem [resolvable:$false] %s3839_s18 }
  0xf8   : > { %v753_v28 = vpack.c.bf16 %v738_v26, %v737_v25  ;;  %v739_v29 = vld [vmem:[#allocation13 + $0x10] sm:$0xff]  ;;  %v740_v30 = vld [vmem:[#allocation13 + $0x18] sm:$0xff]  ;;  %v741_v32 = vld [vmem:[#allocation13 + $0x20] sm:$0xff]  ;;  %v623_v34 = vpack.c.bf16 %v615_v27, %v614_v24  ;;  %s2861_s20 = sshll.u32 %s5249_s26, 12  ;;  %s3841_s25 = scalar_lea.vmem %s3840_s18, 8192 }
  0xf9   : > { %3001 = vmatpush3.bf16.msra.mxu0 %v617_v5  ;;  %v754_v31 = vpack.c.bf16 %v740_v30, %v739_v29  ;;  %v742_v33 = vld [vmem:[#allocation13 + $0x28] sm:$0xff]  ;;  %v898_v35 = vld [vmem:[#allocation10] sm:$0xff]  ;;  %v743_v39 = vld [vmem:[#allocation13 + $0x30] sm:$0xff]  ;;  %p5253_p6 = scmp.ne.s32.totalorder %s5250_s11, 0  ;;  %p3842_p13 = scmp.lt.s32.totalorder %s5005_s30, %s3840_s18 }
  0xfa   : > { %3002 = vmatprep.subr.bf16.mxu0 %v618_v8  ;;  %3030 = vmatprep.subr.bf16.mxu1 %v753_v28  ;;  %v899_v36 = vld [vmem:[#allocation10 + $0x8] sm:$0xff]  ;;  %v755_v37 = vpack.c.bf16 %v742_v33, %v741_v32  ;;  %v576_v38 = vld [vmem:[%s4370_s9] sm:$0xff]  ;;  %v744_v40 = vld [vmem:[#allocation13 + $0x38] sm:$0xff]  ;;  %s5252_s1 = smov %s5251_s17  ;;  %s5003_s22 = scalar_lea.hbm %s5251_s17, %s2861_s20 }
  0xfb   : > { %3031 = vmatpush3.bf16.msra.mxu1 %v753_v28  ;;  %v577_v41 = vld [vmem:[%s4370_s9 + $0x8] sm:$0xff]  ;;  %v554_v42 = vld [vmem:[%s4363_s5 + $0x10] sm:$0xff]  ;;  %v555_v43 = vld [vmem:[%s4363_s5 + $0x18] sm:$0xff]  ;;  %v914_v47 = vpack.c.bf16 %v899_v36, %v898_v35  ;;  %v756_v50 = vpack.c.bf16 %v744_v40, %v743_v39  ;;  %p3837_p4 = pnand %p3836_p7, %p5253_p6  ;;  %p3843_p12 = scmp.lt.s32.totalorder %s3841_s25, %s3835_s28 }
  0xfc   : > { %3032 = vmatprep.subr.bf16.mxu1 %v754_v31  ;;  %v592_v44 = vpack.c.bf16 %v577_v41, %v576_v38  ;;  %v556_v45 = vld [vmem:[%s4363_s5 + $0x20] sm:$0xff]  ;;  %v557_v46 = vld [vmem:[%s4363_s5 + $0x28] sm:$0xff]  ;;  %v900_v48 = vld [vmem:[#allocation10 + $0x10] sm:$0xff]  ;;  %v569_v51 = vpack.c.bf16 %v555_v43, %v554_v42 }
  0xfd   : > { %3003 = vmatpush3.bf16.msra.mxu0 %v618_v8  ;;  %v901_v49 = vld [vmem:[#allocation10 + $0x18] sm:$0xff]  ;;  %v745_v52 = vld [vmem:[#allocation13 + $0x40] sm:$0xff]  ;;  %v746_v53 = vld [vmem:[#allocation13 + $0x48] sm:$0xff]  ;;  %v570_v54 = vpack.c.bf16 %v557_v46, %v556_v45  ;;  %p3838_p1 = pneg %p3837_p4  ;;  %p3844_p9 = por %p3843_p12, %p3842_p13 }
  0xfe   : > { %3004 = vmatprep.subr.bf16.mxu0 %v619_v14  ;;  %3046 = vmatprep.mubr.bf16.mxu1 %v592_v44  ;;  %v915_v55 = vpack.c.bf16 %v901_v49, %v900_v48  ;;  %v902_v56 = vld [vmem:[#allocation10 + $0x20] sm:$0xff]  ;;  %v903_v57 = vld [vmem:[#allocation10 + $0x28] sm:$0xff]  ;;  %v757_v58 = vpack.c.bf16 %v746_v53, %v745_v52  ;;  %v747_v59 = vld [vmem:[#allocation13 + $0x50] sm:$0xff] }
  0xff   : > { %3033 = vmatpush3.bf16.msra.mxu1 %v754_v31  ;;  %v748_v60 = vld [vmem:[#allocation13 + $0x58] sm:$0xff]  ;;  %v558_v61 = vld [vmem:[%s4363_s5 + $0x30] sm:$0xff]  ;;  %v560_v63 = vld [vmem:[%s4363_s5 + $0x40] sm:$0xff]  ;;  %v916_v1 = vpack.c.bf16 %v903_v57, %v902_v56  ;;  %p3845_p0 = pnand %p3844_p9, %p3838_p1 }
 0x100   : > { %3034 = vmatprep.subr.bf16.mxu1 %v755_v37  ;;  %v559_v62 = vld [vmem:[%s4363_s5 + $0x38] sm:$0xff]  ;;  %v561_v0 = vld [vmem:[%s4363_s5 + $0x48] sm:$0xff]  ;;  %v904_v2 = vld [vmem:[#allocation10 + $0x30] sm:$0xff]  ;;  %v758_v4 = vpack.c.bf16 %v748_v60, %v747_v59 }
 0x101   : > { %3005 = vmatpush3.bf16.msra.mxu0 %v619_v14  ;;  %v905_v3 = vld [vmem:[#allocation10 + $0x38] sm:$0xff]  ;;  %v571_v5 = vpack.c.bf16 %v559_v62, %v558_v61  ;;  %v749_v6 = vld [vmem:[#allocation13 + $0x60] sm:$0xff]  ;;  %v750_v7 = vld [vmem:[#allocation13 + $0x68] sm:$0xff]  ;;  %v572_v8 = vpack.c.bf16 %v561_v0, %v560_v63 }
 0x102   : > { %3006 = vmatprep.subr.bf16.mxu0 %v620_v17  ;;  %v917_v9 = vpack.c.bf16 %v905_v3, %v904_v2  ;;  %v906_v10 = vld [vmem:[#allocation10 + $0x40] sm:$0xff]  ;;  %v907_v11 = vld [vmem:[#allocation10 + $0x48] sm:$0xff]  ;;  %v759_v12 = vpack.c.bf16 %v750_v7, %v749_v6  ;;  %v751_v13 = vld [vmem:[#allocation13 + $0x70] sm:$0xff] }
 0x103   : > { %3035 = vmatpush3.bf16.msra.mxu1 %v755_v37  ;;  %v752_v14 = vld [vmem:[#allocation13 + $0x78] sm:$0xff]  ;;  %v562_v15 = vld [vmem:[%s4363_s5 + $0x50] sm:$0xff]  ;;  %v564_v18 = vld [vmem:[%s4363_s5 + $0x60] sm:$0xff] }
 0x104   : > { %3036 = vmatprep.subr.bf16.mxu1 %v756_v50  ;;  %v563_v16 = vld [vmem:[%s4363_s5 + $0x58] sm:$0xff]  ;;  %v565_v19 = vld [vmem:[%s4363_s5 + $0x68] sm:$0xff]  ;;  %v760_v22 = vpack.c.bf16 %v752_v14, %v751_v13  ;;  %v578_v26 = vld [vmem:[%s4370_s9 + $0x10] sm:$0xff] }
 0x105   : > { %3007 = vmatpush3.bf16.msra.mxu0 %v620_v17  ;;  %v918_v17 = vpack.c.bf16 %v907_v11, %v906_v10  ;;  %v909_v21 = vld [vmem:[#allocation10 + $0x58] sm:$0xff]  ;;  %v574_v24 = vpack.c.bf16 %v565_v19, %v564_v18  ;;  %v910_v28 = vld [vmem:[#allocation10 + $0x60] sm:$0xff]  ;;  %v911_v29 = vld [vmem:[#allocation10 + $0x68] sm:$0xff] }
 0x106   : > { %3008 = vmatprep.subr.bf16.mxu0 %v621_v20  ;;  %v579_v27 = vld [vmem:[%s4370_s9 + $0x18] sm:$0xff]  ;;  %v566_v30 = vld [vmem:[%s4363_s5 + $0x70] sm:$0xff]  ;;  %v920_v33 = vpack.c.bf16 %v911_v29, %v910_v28  ;;  %v875_v35 = vld [vmem:[%s4355_s10 + $0x8] sm:$0xff] }
 0x107   : > { %3037 = vmatpush3.bf16.msra.mxu1 %v756_v50  ;;  %v567_v31 = vld [vmem:[%s4363_s5 + $0x78] sm:$0xff]  ;;  %v593_v32 = vpack.c.bf16 %v579_v27, %v578_v26  ;;  %v912_v36 = vld [vmem:[#allocation10 + $0x70] sm:$0xff]  ;;  %v878_v43 = vld [vmem:[%s4355_s10 + $0x20] sm:$0xff] }
 0x108   : > { %3038 = vmatprep.subr.bf16.mxu1 %v757_v58  ;;  %v913_v37 = vld [vmem:[#allocation10 + $0x78] sm:$0xff]  ;;  %v575_v38 = vpack.c.bf16 %v567_v31, %v566_v30  ;;  %v876_v41 = vld [vmem:[%s4355_s10 + $0x10] sm:$0xff]  ;;  %v879_v44 = vld [vmem:[%s4355_s10 + $0x28] sm:$0xff] }
 0x109   : > { %3009 = vmatpush3.bf16.msra.mxu0 %v621_v20  ;;  %v908_v20 = vld [vmem:[#allocation10 + $0x50] sm:$0xff]  ;;  %v921_v40 = vpack.c.bf16 %v913_v37, %v912_v36  ;;  %v877_v42 = vld [vmem:[%s4355_s10 + $0x18] sm:$0xff]  ;;  %v892_v46 = vpack.c.bf16 %v879_v44, %v878_v43  ;;  %v882_v49 = vld [vmem:[%s4355_s10 + $0x40] sm:$0xff] }
 0x10a   : > { %3010 = vmatprep.subr.bf16.mxu0 %v622_v23  ;;  %v919_v25 = vpack.c.bf16 %v909_v21, %v908_v20  ;;  %v891_v45 = vpack.c.bf16 %v877_v42, %v876_v41  ;;  %v881_v48 = vld [vmem:[%s4355_s10 + $0x38] sm:$0xff]  ;;  %v883_v50 = vld [vmem:[%s4355_s10 + $0x48] sm:$0xff]  ;;  %v884_v53 = vld [vmem:[%s4355_s10 + $0x50] sm:$0xff] }
 0x10b   : > { %3039 = vmatpush3.bf16.msra.mxu1 %v757_v58  ;;  %v894_v52 = vpack.c.bf16 %v883_v50, %v882_v49  ;;  %v887_v56 = vld [vmem:[%s4355_s10 + $0x68] sm:$0xff]  ;;  %v888_v59 = vld [vmem:[%s4355_s10 + $0x70] sm:$0xff]  ;;  %v889_v60 = vld [vmem:[%s4355_s10 + $0x78] sm:$0xff] }
 0x10c   : > { %3040 = vmatprep.subr.bf16.mxu1 %v758_v4  ;;  %v897_v61 = vpack.c.bf16 %v889_v60, %v888_v59  ;;  %v580_v62 = vld [vmem:[%s4370_s9 + $0x20] sm:$0xff]  ;;  %v581_v63 = vld [vmem:[%s4370_s9 + $0x28] sm:$0xff]  ;;  %v582_v0 = vld [vmem:[%s4370_s9 + $0x30] sm:$0xff] }
 0x10d   : > { %3011 = vmatpush3.bf16.msra.mxu0 %v622_v23  ;;  %v573_v23 = vpack.c.bf16 %v563_v16, %v562_v15  ;;  %v583_v2 = vld [vmem:[%s4370_s9 + $0x38] sm:$0xff]  ;;  %v586_v6 = vld [vmem:[%s4370_s9 + $0x50] sm:$0xff]  ;;  %v588_v10 = vld [vmem:[%s4370_s9 + $0x60] sm:$0xff] }
 0x10e   : > { %3012 = vmatprep.subr.bf16.mxu0 %v623_v34  ;;  %v595_v3 = vpack.c.bf16 %v583_v2, %v582_v0  ;;  %v589_v11 = vld [vmem:[%s4370_s9 + $0x68] sm:$0xff]  ;;  %v591_v14 = vld [vmem:[%s4370_s9 + $0x78] sm:$0xff] }
 0x10f   : > { %3041 = vmatpush3.bf16.msra.mxu1 %v758_v4  ;;  %v584_v4 = vld [vmem:[%s4370_s9 + $0x40] sm:$0xff]  ;;  %v598_v13 = vpack.c.bf16 %v589_v11, %v588_v10 }
 0x110   : > { %3042 = vmatprep.subr.bf16.mxu1 %v759_v12 }
 0x111   : > { %3013 = vmatpush3.bf16.msra.mxu0 %v623_v34  ;;  %v874_v34 = vld [vmem:[%s4355_s10] sm:$0xff] }
 0x112   : > { %3062 = vmatprep.subr.bf16.mxu0 %v914_v47  ;;  %v890_v39 = vpack.c.bf16 %v875_v35, %v874_v34 }
 0x113   : > { %3043 = vmatpush3.bf16.msra.mxu1 %v759_v12  ;;  %v590_v12 = vld [vmem:[%s4370_s9 + $0x70] sm:$0xff] }
 0x114   : > { %3015 = vmatmul.mubr.bf16.vlgmr.msra.gmra.mrb[0].mxu0 %v569_v51  ;;  %3044 = vmatprep.subr.bf16.mxu1 %v760_v22  ;;  %v599_v15 = vpack.c.bf16 %v591_v14, %v590_v12 }
 0x115   : > { %3018 = vmatprep.mubr.bf16.mxu0 %v570_v54  ;;  %3063 = vmatpush3.bf16.msra.mxu0 %v914_v47  ;;  %v880_v47 = vld [vmem:[%s4355_s10 + $0x30] sm:$0xff]  ;;  %v885_v54 = vld [vmem:[%s4355_s10 + $0x58] sm:$0xff] }
 0x116   : > { %3064 = vmatprep.subr.bf16.mxu0 %v915_v55  ;;  %v893_v51 = vpack.c.bf16 %v881_v48, %v880_v47  ;;  %v895_v57 = vpack.c.bf16 %v885_v54, %v884_v53 }
 0x117   : > { %3045 = vmatpush3.bf16.msra.mxu1 %v760_v22 }
 0x119   : > { %3065 = vmatpush3.bf16.msra.mxu0 %v915_v55  ;;  %v886_v55 = vld [vmem:[%s4355_s10 + $0x60] sm:$0xff] }
 0x11a   : > { %3066 = vmatprep.subr.bf16.mxu0 %v916_v1  ;;  %3047 = vmatmul.mubr.bf16.vlgmr.msra.gmra.mrb[0].mxu1 %v593_v32  ;;  %v896_v58 = vpack.c.bf16 %v887_v56, %v886_v55 }
 0x11c   : > { %3019 = vmatmul.mubr.bf16.gmra.mrb[4].mxu0 %v571_v5  ;;  %v585_v5 = vld [vmem:[%s4370_s9 + $0x48] sm:$0xff] }
 0x11d   : > { %3022 = vmatprep.mubr.bf16.mxu0 %v572_v8  ;;  %3067 = vmatpush3.bf16.msra.mxu0 %v916_v1  ;;  %v594_v1 = vpack.c.bf16 %v581_v63, %v580_v62  ;;  %v596_v7 = vpack.c.bf16 %v585_v5, %v584_v4  ;;  %v587_v8 = vld [vmem:[%s4370_s9 + $0x58] sm:$0xff] }
 0x11e   : > { %3068 = vmatprep.subr.bf16.mxu0 %v917_v9 }
 0x11f   : > { %3050 = vmatprep.mubr.bf16.mxu1 %v594_v1 }
 0x121   : > { %3069 = vmatpush3.bf16.msra.mxu0 %v917_v9  ;;  %v597_v9 = vpack.c.bf16 %v587_v8, %v586_v6 }
 0x122   : > { %3070 = vmatprep.subr.bf16.mxu0 %v918_v17  ;;  %3051 = vmatmul.mubr.bf16.gmra.mrb[4].mxu1 %v595_v3 }
 0x123   : > { %3054 = vmatprep.mubr.bf16.mxu1 %v596_v7 }
 0x124   : > { %3023 = vmatmul.mubr.bf16.gmra.mrb[8].mxu0 %v573_v23 }
 0x125   : > { %3071 = vmatpush3.bf16.msra.mxu0 %v918_v17  ;;  %3026 = vmatprep.mubr.bf16.mxu0 %v574_v24 }
 0x126   : > { %3072 = vmatprep.subr.bf16.mxu0 %v919_v25 }
 0x129   : > { %3073 = vmatpush3.bf16.msra.mxu0 %v919_v25 }
 0x12a   : > { %3074 = vmatprep.subr.bf16.mxu0 %v920_v33  ;;  %3055 = vmatmul.mubr.bf16.gmra.mrb[8].mxu1 %v597_v9 }
 0x12b   : > { %3058 = vmatprep.mubr.bf16.mxu1 %v598_v13 }
 0x12c   : > { %3027 = vmatmul.mubr.bf16.gmra.mrb[12].mxu0 %v575_v38 }
 0x12d   : > { %3075 = vmatpush3.bf16.msra.mxu0 %v920_v33  ;;  %3078 = vmatprep.mubr.bf16.mxu0 %v890_v39 }
 0x12e   : > { %3076 = vmatprep.subr.bf16.mxu0 %v921_v40 }
 0x131   : > { %3077 = vmatpush3.bf16.msra.mxu0 %v921_v40 }
 0x132   : > { %3059 = vmatmul.mubr.bf16.gmra.mrb[12].mxu1 %v599_v15 }
 0x134   : > { %3079 = vmatmul.mubr.bf16.vlgmr.msra.gmra.mrb[16].mxu0 %v891_v45 }
 0x135   : > { %3082 = vmatprep.mubr.bf16.mxu0 %v892_v46 }
 0x13c   : > { %3083 = vmatmul.mubr.bf16.gmra.mrb[20].mxu0 %v893_v51 }
 0x13d   : > { %3086 = vmatprep.mubr.bf16.mxu0 %v894_v52 }
 0x144   : > { %3087 = vmatmul.mubr.bf16.gmra.mrb[24].mxu0 %v895_v57 }
 0x145   : > { %3090 = vmatprep.mubr.bf16.mxu0 %v896_v58 }
 0x14c   : > { %3091 = vmatmul.mubr.bf16.gmra.mrb[28].mxu0 %v897_v61 }
 0x1e7   : > { %v3016_v16 = vpop.f32.mrb[0].mxu0 }
 0x1e8   : > { %v658_v17 = vpop.f32.mrb[1].mxu0 }
 0x1e9   : > { %v3017_v18 = vpop.f32.mrb[2].mxu0 }
 0x1ea   : > { %v722_v19 = vpack.c.bf16 %v3017_v18, %v3016_v16  ;;  %v661_v20 = vpop.f32.mrb[3].mxu0 }
 0x1eb   : > { %v721_v21 = vpack.c.bf16 %v661_v20, %v658_v17 }
 0x1ec   : > { %v1112_v29 = vsel %vm1083_vm0, %v722_v19, 0 }
 0x1ed   : > { %1687 = vrot.lane.b32.xlu0 %v721_v21, %s3972_s19  ;;  %3318 = vmatprep.subr.msk.bf16.mxu1 %vm1083_vm0, %v721_v21  ;;  %v1109_v22 = vsel %vm1083_vm0, %v721_v21, 0  ;;  %v3048_v16 = vpop.f32.mrb[0].mxu1 }
 0x1ee   : > { %3095 = vmatpush3.bf16.xpose.msra.mxu1 %v1109_v22 }
 0x1ef   : > { %3319 = vmatprep.subr.msk.bf16.mxu1 %vm1083_vm0, %v722_v19  ;;  %v3020_v23 = vpop.f32.mrb[4].mxu0 }
 0x1f0   : > { %v674_v24 = vpop.f32.mrb[5].mxu0 }
 0x1f1   : > { %1689 = vrot.lane.b32.xlu0 %v722_v19, %s3972_s19  ;;  %v3021_v25 = vpop.f32.mrb[6].mxu0  ;;  %v795_v19 = vpop.f32.mrb[1].mxu1 }
 0x1f2   : > { %v724_v26 = vpack.c.bf16 %v3021_v25, %v3020_v23  ;;  %v677_v27 = vpop.f32.mrb[7].mxu0  ;;  %v3049_v22 = vpop.f32.mrb[2].mxu1 }
 0x1f3   : > { %v723_v28 = vpack.c.bf16 %v677_v27, %v674_v24  ;;  %v4462_v24 = vpack.c.bf16 %v3049_v22, %v3048_v16  ;;  %v798_v25 = vpop.f32.mrb[3].mxu1 }
 0x1f4   : > { %1693 = vrot.lane.b32.xlu1 %v724_v26, %s3972_s19  ;;  %v1118_v43 = vsel %vm1083_vm0, %v724_v26, 0  ;;  %v4466_v27 = vpack.c.bf16 %v798_v25, %v795_v19 }
 0x1f5   : > { %v1115_v36 = vsel %vm1083_vm0, %v723_v28, 0 }
 0x1f6   : > { %3097 = vmatpush3.bf16.xpose.msra.mxu1 %v1112_v29  ;;  %3126 = vmatprep.subr.bf16.mxu0 %v4466_v27 }
 0x1f7   : > { %3320 = vmatprep.subr.msk.bf16.mxu1 %vm1083_vm0, %v723_v28  ;;  %v3024_v30 = vpop.f32.mrb[8].mxu0  ;;  %3127 = vmatpush3.bf16.msra.mxu0 %v4466_v27 }
 0x1f8   : > { %1691 = vrot.lane.b32.xlu1 %v723_v28, %s3972_s19  ;;  %v690_v31 = vpop.f32.mrb[9].mxu0  ;;  %3128 = vmatprep.subr.bf16.mxu0 %v4462_v24 }
 0x1f9   : > { %v3025_v32 = vpop.f32.mrb[10].mxu0 }
 0x1fa   : > { %v726_v33 = vpack.c.bf16 %v3025_v32, %v3024_v30  ;;  %v693_v34 = vpop.f32.mrb[11].mxu0  ;;  %v3052_v30 = vpop.f32.mrb[4].mxu1 }
 0x1fb   : > { %v725_v35 = vpack.c.bf16 %v693_v34, %v690_v31  ;;  %3129 = vmatpush3.bf16.msra.mxu0 %v4462_v24  ;;  %v811_v32 = vpop.f32.mrb[5].mxu1 }
 0x1fc   : > { %1697 = vrot.lane.b32.xlu1 %v726_v33, %s3972_s19  ;;  %v1124_v0 = vsel %vm1083_vm0, %v726_v33, 0  ;;  %v3053_v34 = vpop.f32.mrb[6].mxu1 }
 0x1fd   : > { %1695 = vrot.lane.b32.xlu0 %v725_v35, %s3972_s19  ;;  %v1121_v53 = vsel %vm1083_vm0, %v725_v35, 0 }
 0x1fe   : > { %3099 = vmatpush3.bf16.xpose.msra.mxu1 %v1115_v36  ;;  %v814_v36 = vpop.f32.mrb[7].mxu1 }
 0x1ff   : > { %3321 = vmatprep.subr.msk.bf16.mxu1 %vm1083_vm0, %v724_v26  ;;  %v3028_v37 = vpop.f32.mrb[12].mxu0 }
 0x200   : > { %v706_v38 = vpop.f32.mrb[13].mxu0 }
 0x201   : > { %v3029_v39 = vpop.f32.mrb[14].mxu0 }
 0x202   : > { %v4441_v40 = vpack.c.bf16 %v3029_v39, %v3028_v37  ;;  %v709_v41 = vpop.f32.mrb[15].mxu0  ;;  %v4487_v37 = vpack.c.bf16 %v814_v36, %v811_v32 }
 0x203   : > { %v727_v42 = vpack.c.bf16 %v709_v41, %v706_v38 }
 0x204   : > { %1701 = vrot.lane.b32.xlu1 %v4441_v40, %s3972_s19  ;;  %v1130_v28 = vsel %vm1083_vm0, %v4441_v40, 0  ;;  %3130 = vmatprep.subr.bf16.mxu0 %v4487_v37 }
 0x205   : > { %1699 = vrot.lane.b32.xlu0 %v727_v42, %s3972_s19  ;;  %v1127_v11 = vsel %vm1083_vm0, %v727_v42, 0  ;;  %3131 = vmatpush3.bf16.msra.mxu0 %v4487_v37 }
 0x206   : > { %3101 = vmatpush3.bf16.xpose.msra.mxu1 %v1118_v43 }
 0x207   : > { %3322 = vmatprep.subr.msk.bf16.mxu1 %vm1083_vm0, %v725_v35  ;;  %v3080_v44 = vpop.f32.mrb[16].mxu0  ;;  %v4485_v35 = vpack.c.bf16 %v3053_v34, %v3052_v30 }
 0x208   : > { %v1045_v45 = vmul.f32 0.125, %v3080_v44  ;;  %v956_v46 = vpop.f32.mrb[17].mxu0 }
 0x209   : > { %v1043_v47 = vmul.f32 0.125, %v956_v46  ;;  %v3081_v48 = vpop.f32.mrb[18].mxu0  ;;  %3132 = vmatprep.subr.bf16.mxu0 %v4485_v35 }
 0x20a   : > { %v1046_v49 = vmul.f32 0.125, %v3081_v48  ;;  %v959_v50 = vpop.f32.mrb[19].mxu0  ;;  %3133 = vmatpush3.bf16.msra.mxu0 %v4485_v35 }
 0x20b   : > { %v1044_v51 = vmul.f32 0.125, %v959_v50 }
 0x20c   : > { %v1060_v52 = vpack.c.bf16 %v1046_v49, %v1045_v45 }
 0x20d   : > { %v1059_v54 = vpack.c.bf16 %v1044_v51, %v1043_v47 }
 0x20e   : > { %3103 = vmatpush3.bf16.xpose.msra.mxu1 %v1121_v53  ;;  %1665 = vrot.lane.b32.xlu1 %v1060_v52, %s3972_s19 }
 0x20f   : > { %3323 = vmatprep.subr.msk.bf16.mxu1 %vm1083_vm0, %v726_v33  ;;  %3110 = vmatprep.mubr.msk.bf16.mxu1 %vm1083_vm0, %v1059_v54  ;;  %v3084_v55 = vpop.f32.mrb[20].mxu0 }
 0x210   : > { %1663 = vrot.lane.b32.xlu0 %v1059_v54, %s3972_s19  ;;  %v1049_v56 = vmul.f32 0.125, %v3084_v55  ;;  %v972_v57 = vpop.f32.mrb[21].mxu0 }
 0x211   : > { %v1047_v58 = vmul.f32 0.125, %v972_v57  ;;  %v3085_v59 = vpop.f32.mrb[22].mxu0 }
 0x212   : > { %v1050_v60 = vmul.f32 0.125, %v3085_v59  ;;  %v975_v61 = vpop.f32.mrb[23].mxu0 }
 0x213   : > { %v1048_v62 = vmul.f32 0.125, %v975_v61 }
 0x214   : > { %v1062_v63 = vpack.c.bf16 %v1050_v60, %v1049_v56 }
 0x215   : > { %v1061_v1 = vpack.c.bf16 %v1048_v62, %v1047_v58 }
 0x216   : > { %3105 = vmatpush3.bf16.xpose.msra.mxu1 %v1124_v0  ;;  %1669 = vrot.lane.b32.xlu1 %v1062_v63, %s3972_s19 }
 0x217   : > { %3324 = vmatprep.subr.msk.bf16.mxu1 %vm1083_vm0, %v727_v42  ;;  %v3088_v2 = vpop.f32.mrb[24].mxu0  ;;  %1667 = vrot.lane.b32.xlu0 %v1061_v1, %s3972_s19 }
 0x218   : > { %v1053_v3 = vmul.f32 0.125, %v3088_v2  ;;  %v988_v4 = vpop.f32.mrb[25].mxu0 }
 0x219   : > { %v1051_v5 = vmul.f32 0.125, %v988_v4  ;;  %v3089_v6 = vpop.f32.mrb[26].mxu0 }
 0x21a   : > { %v1054_v7 = vmul.f32 0.125, %v3089_v6  ;;  %v991_v8 = vpop.f32.mrb[27].mxu0 }
 0x21b   : > { %v1052_v9 = vmul.f32 0.125, %v991_v8 }
 0x21c   : > { %v1064_v10 = vpack.c.bf16 %v1054_v7, %v1053_v3 }
 0x21d   : > { %v1063_v12 = vpack.c.bf16 %v1052_v9, %v1051_v5 }
 0x21e   : > { %3107 = vmatpush3.bf16.xpose.msra.mxu1 %v1127_v11  ;;  %1673 = vrot.lane.b32.xlu1 %v1064_v10, %s3972_s19 }
 0x21f   : > { %3325 = vmatprep.subr.msk.bf16.mxu1 %vm1083_vm0, %v4441_v40  ;;  %v3092_v13 = vpop.f32.mrb[28].mxu0  ;;  %1671 = vrot.lane.b32.xlu0 %v1063_v12, %s3972_s19  ;;  %v3056_v40 = vpop.f32.mrb[8].mxu1 }
 0x220   : > { %v1057_v14 = vmul.f32 0.125, %v3092_v13  ;;  %v1004_v15 = vpop.f32.mrb[29].mxu0  ;;  %v827_v41 = vpop.f32.mrb[9].mxu1 }
 0x221   : > { %v1055_v17 = vmul.f32 0.125, %v1004_v15  ;;  %v3093_v18 = vpop.f32.mrb[30].mxu0  ;;  %v3057_v43 = vpop.f32.mrb[10].mxu1 }
 0x222   : > { %v1058_v20 = vmul.f32 0.125, %v3093_v18  ;;  %v1007_v21 = vpop.f32.mrb[31].mxu0  ;;  %v4494_v44 = vpack.c.bf16 %v3057_v43, %v3056_v40  ;;  %v830_v45 = vpop.f32.mrb[11].mxu1 }
 0x223   : > { %v1056_v23 = vmul.f32 0.125, %v1007_v21  ;;  %v4497_v47 = vpack.c.bf16 %v830_v45, %v827_v41  ;;  %v3060_v48 = vpop.f32.mrb[12].mxu1 }
 0x224   : > { %v4464_v26 = vpack.c.bf16 %v1058_v20, %v1057_v14  ;;  %v843_v49 = vpop.f32.mrb[13].mxu1 }
 0x225   : > { %v1065_v29 = vpack.c.bf16 %v1056_v23, %v1055_v17  ;;  %3134 = vmatprep.subr.bf16.mxu0 %v4497_v47  ;;  %v3061_v51 = vpop.f32.mrb[14].mxu1 }
 0x226   : > { %3109 = vmatpush3.bf16.xpose.msra.mxu1 %v1130_v28  ;;  %3135 = vmatpush3.bf16.msra.mxu0 %v4497_v47  ;;  %v846_v53 = vpop.f32.mrb[15].mxu1 }
 0x227   : > { %1675 = vrot.lane.b32.xlu0 %v1065_v29, %s3972_s19  ;;  %3136 = vmatprep.subr.bf16.mxu0 %v4494_v44  ;;  %v4508_v54 = vpack.c.bf16 %v846_v53, %v843_v49 }
 0x22a   : > { %3137 = vmatpush3.bf16.msra.mxu0 %v4494_v44 }
 0x22b   : > { %3138 = vmatprep.subr.bf16.mxu0 %v4508_v54 }
 0x22d   : > { %3111 = vmatmul.mubr.msk.bf16.vlgmr.msra.gmra.mrb[16].mxu1 %vm1083_vm0, %v1060_v52  ;;  %v4504_v52 = vpack.c.bf16 %v3061_v51, %v3060_v48 }
 0x22e   : > { %3114 = vmatprep.mubr.msk.bf16.mxu1 %vm1083_vm0, %v1061_v1  ;;  %3139 = vmatpush3.bf16.msra.mxu0 %v4508_v54 }
 0x22f   : > { %3140 = vmatprep.subr.bf16.mxu0 %v4504_v52 }
 0x232   : > { %3141 = vmatpush3.bf16.msra.mxu0 %v4504_v52 }
 0x235   : > { %3115 = vmatmul.mubr.msk.bf16.gmra.mrb[20].mxu1 %vm1083_vm0, %v1062_v63 }
 0x236   : > { %3118 = vmatprep.mubr.msk.bf16.mxu1 %vm1083_vm0, %v1063_v12 }
 0x23d   : > { %3119 = vmatmul.mubr.msk.bf16.gmra.mrb[24].mxu1 %vm1083_vm0, %v1064_v10 }
 0x23e   : > { %3122 = vmatprep.mubr.msk.bf16.mxu1 %vm1083_vm0, %v1065_v29 }
 0x245   : > { %3123 = vmatmul.mubr.msk.bf16.gmra.mrb[28].mxu1 %vm1083_vm0, %v4464_v26 }
 0x25f   : > { %v1688_v31 = vpop.permute.xlu0 %1687 }
 0x260   : > { %3326 = vmatprep.subr.msk.bf16.mxu1 %vm1083_vm0, %v1688_v31  ;;  %v1728_v33 = vsel %vm1083_vm0, %v1688_v31, 0 }
 0x261   : > { %3183 = vmatpush3.bf16.xpose.msra.mxu1 %v1728_v33 }
 0x263   : > { %v1690_v38 = vpop.permute.xlu0 %1689 }
 0x264   : > { %3327 = vmatprep.subr.msk.bf16.mxu1 %vm1083_vm0, %v1690_v38  ;;  %v1731_v42 = vsel %vm1083_vm0, %v1690_v38, 0 }
 0x266   : > { %v1694_v39 = vpop.permute.xlu1 %1693 }
 0x267   : > { %v1737_v56 = vsel %vm1083_vm0, %v1694_v39, 0 }
 0x269   : > { %3185 = vmatpush3.bf16.xpose.msra.mxu1 %v1731_v42 }
 0x26a   : > { %v1692_v46 = vpop.permute.xlu1 %1691 }
 0x26b   : > { %3328 = vmatprep.subr.msk.bf16.mxu1 %vm1083_vm0, %v1692_v46  ;;  %v1734_v50 = vsel %vm1083_vm0, %v1692_v46, 0 }
 0x26e   : > { %v1698_v59 = vpop.permute.xlu1 %1697 }
 0x26f   : > { %v1696_v55 = vpop.permute.xlu0 %1695  ;;  %v1743_v61 = vsel %vm1083_vm0, %v1698_v59, 0 }
 0x270   : > { %v1740_v58 = vsel %vm1083_vm0, %v1696_v55, 0 }
 0x271   : > { %3187 = vmatpush3.bf16.xpose.msra.mxu1 %v1734_v50 }
 0x272   : > { %3329 = vmatprep.subr.msk.bf16.mxu1 %vm1083_vm0, %v1694_v39 }
 0x276   : > { %v1702_v63 = vpop.permute.xlu1 %1701 }
 0x277   : > { %v1700_v57 = vpop.permute.xlu0 %1699  ;;  %v1749_v0 = vsel %vm1083_vm0, %v1702_v63, 0 }
 0x278   : > { %v1746_v62 = vsel %vm1083_vm0, %v1700_v57, 0 }
 0x279   : > { %3189 = vmatpush3.bf16.xpose.msra.mxu1 %v1737_v56 }
 0x27a   : > { %3330 = vmatprep.subr.msk.bf16.mxu1 %vm1083_vm0, %v1696_v55 }
 0x280   : > { %v1666_v2 = vpop.permute.xlu1 %1665 }
 0x281   : > { %3191 = vmatpush3.bf16.xpose.msra.mxu1 %v1740_v58 }
 0x282   : > { %3331 = vmatprep.subr.msk.bf16.mxu1 %vm1083_vm0, %v1698_v59  ;;  %v1664_v60 = vpop.permute.xlu0 %1663 }
 0x283   : > { %3198 = vmatprep.mubr.msk.bf16.mxu1 %vm1083_vm0, %v1664_v60 }
 0x288   : > { %v1670_v3 = vpop.permute.xlu1 %1669 }
 0x289   : > { %3193 = vmatpush3.bf16.xpose.msra.mxu1 %v1743_v61  ;;  %v1668_v1 = vpop.permute.xlu0 %1667 }
 0x28a   : > { %3332 = vmatprep.subr.msk.bf16.mxu1 %vm1083_vm0, %v1700_v57 }
 0x290   : > { %v1674_v5 = vpop.permute.xlu1 %1673 }
 0x291   : > { %3195 = vmatpush3.bf16.xpose.msra.mxu1 %v1746_v62  ;;  %v1672_v4 = vpop.permute.xlu0 %1671 }
 0x292   : > { %3333 = vmatprep.subr.msk.bf16.mxu1 %vm1083_vm0, %v1702_v63 }
 0x299   : > { %3197 = vmatpush3.bf16.xpose.msra.mxu1 %v1749_v0  ;;  %v1676_v6 = vpop.permute.xlu0 %1675 }
 0x2a0   : > { %3199 = vmatmul.mubr.msk.bf16.vlgmr.msra.gmra.mrb[32].mxu1 %vm1083_vm0, %v1666_v2 }
 0x2a1   : > { %3202 = vmatprep.mubr.msk.bf16.mxu1 %vm1083_vm0, %v1668_v1 }
 0x2a8   : > { %3203 = vmatmul.mubr.msk.bf16.gmra.mrb[36].mxu1 %vm1083_vm0, %v1670_v3 }
 0x2a9   : > { %3206 = vmatprep.mubr.msk.bf16.mxu1 %vm1083_vm0, %v1672_v4 }
 0x2b0   : > { %3207 = vmatmul.mubr.msk.bf16.gmra.mrb[40].mxu1 %vm1083_vm0, %v1674_v5 }
 0x2b1   : > { %3210 = vmatprep.mubr.msk.bf16.mxu1 %vm1083_vm0, %v1676_v6 }
 0x300   : > { %v3112_v7 = vpop.f32.mrb[16].mxu1 }
 0x301   : > { %1233 = vmax.xlane.f32.xlu1 %v3112_v7  ;;  %v1166_v8 = vpop.f32.mrb[17].mxu1 }
 0x302   : > { %1229 = vmax.xlane.f32.xlu0 %v1166_v8  ;;  %v3113_v9 = vpop.f32.mrb[18].mxu1 }
 0x303   : > { %v1169_v10 = vpop.f32.mrb[19].mxu1 }
 0x305   : > { %1235 = vmax.xlane.f32.xlu1 %v3113_v9 }
 0x308   : > { %v3116_v11 = vpop.f32.mrb[20].mxu1 }
 0x309   : > { %1231 = vmax.xlane.f32.xlu1 %v1169_v10  ;;  %v1182_v12 = vpop.f32.mrb[21].mxu1 }
 0x30a   : > { %1237 = vmax.xlane.f32.xlu0 %v1182_v12  ;;  %v4530_v13 = vpop.f32.mrb[22].mxu1 }
 0x30b   : > { %v4532_v14 = vpop.f32.mrb[23].mxu1 }
 0x30e   : > { %1241 = vmax.xlane.f32.xlu0 %v3116_v11 }
 0x310   : > { %v4534_v15 = vpop.f32.mrb[24].mxu1 }
 0x311   : > { %v4536_v16 = vpop.f32.mrb[25].mxu1 }
 0x312   : > { %1243 = vmax.xlane.f32.xlu0 %v4530_v13  ;;  %v4539_v17 = vpop.f32.mrb[26].mxu1 }
 0x313   : > { %v4541_v18 = vpop.f32.mrb[27].mxu1 }
 0x316   : > { %1245 = vmax.xlane.f32.xlu0 %v4536_v16 }
 0x318   : > { %v4544_v19 = vpop.f32.mrb[28].mxu1 }
 0x319   : > { %v4546_v20 = vpop.f32.mrb[29].mxu1 }
 0x31a   : > { %1677 = vrot.lane.b32.xlu1 %v4464_v26, %s3972_s19  ;;  %1247 = vmax.xlane.f32.xlu0 %v4541_v18  ;;  %v4551_v21 = vpop.f32.mrb[30].mxu1 }
 0x31b   : > { %v4553_v22 = vpop.f32.mrb[31].mxu1 }
 0x31e   : > { %1251 = vmax.xlane.f32.xlu0 %v4539_v17 }
 0x322   : > { %1255 = vmax.xlane.f32.xlu0 %v4553_v22 }
 0x326   : > { %1259 = vmax.xlane.f32.xlu0 %v4551_v21 }
 0x33e   : > { %1239 = vmax.xlane.f32.xlu1 %v4532_v14 }
 0x342   : > { %1249 = vmax.xlane.f32.xlu1 %v4534_v15 }
 0x346   : > { %1253 = vmax.xlane.f32.xlu1 %v4546_v20 }
 0x34a   : > { %1257 = vmax.xlane.f32.xlu1 %v4544_v19 }
 0x373   : > { %v4562_v23 = vpop.f32.mrb[32].mxu1 }
 0x374   : > { %v4564_v25 = vpop.f32.mrb[33].mxu1 }
 0x375   : > { %v4566_v26 = vpop.f32.mrb[34].mxu1 }
 0x376   : > { %v4568_v28 = vpop.f32.mrb[35].mxu1 }
 0x37b   : > { %v4570_v29 = vpop.f32.mrb[36].mxu1 }
 0x37c   : > { %v4572_v30 = vpop.f32.mrb[37].mxu1 }
 0x37d   : > { %v4574_v31 = vpop.f32.mrb[38].mxu1 }
 0x37e   : > { %v4576_v32 = vpop.f32.mrb[39].mxu1 }
 0x383   : > { %v4578_v33 = vpop.f32.mrb[40].mxu1 }
 0x384   : > { %v4580_v34 = vpop.f32.mrb[41].mxu1 }
 0x385   : > { %v4582_v36 = vpop.f32.mrb[42].mxu1 }
 0x386   : > { %v4584_v38 = vpop.f32.mrb[43].mxu1 }
 0x38e   : > { %v1234_v39 = vpop.xlane.xlu1 %1233 }
 0x38f   : > { %v1230_v40 = vpop.xlane.xlu0 %1229  ;;  %v1263_v41 = vsub.f32 %v3112_v7, %v1234_v39 }
 0x390   : > { %v1261_v42 = vsub.f32 %v1166_v8, %v1230_v40 }
 0x391   : > { %v1281_v46 = vmul.f32 1.442695, %v1263_v41 }
 0x392   : > { %v1277_v43 = vmul.f32 1.442695, %v1261_v42  ;;  %v1236_v45 = vpop.xlane.xlu1 %1235 }
 0x393   : > { %v1264_v49 = vsub.f32 %v3113_v9, %v1236_v45 }
 0x394   : > { %3457 = vpow2.f32 %v1277_v43 }
 0x395   : > { %3459 = vpow2.f32 %v1281_v46  ;;  %v1283_v58 = vmul.f32 1.442695, %v1264_v49 }
 0x396   : > { %v1232_v48 = vpop.xlane.xlu1 %1231 }
 0x397   : > { %v1262_v50 = vsub.f32 %v1169_v10, %v1232_v48  ;;  %v1238_v51 = vpop.xlane.xlu0 %1237 }
 0x398   : > { %v1265_v53 = vsub.f32 %v1182_v12, %v1238_v51 }
 0x399   : > { %v1279_v55 = vmul.f32 1.442695, %v1262_v50 }
 0x39a   : > { %v1285_v56 = vmul.f32 1.442695, %v1265_v53  ;;  %v1678_v57 = vpop.permute.xlu1 %1677 }
 0x39b   : > { %3461 = vpow2.f32 %v1279_v55  ;;  %3211 = vmatmul.mubr.msk.bf16.gmra.mrb[44].mxu1 %vm1083_vm0, %v1678_v57  ;;  %v1242_v59 = vpop.xlane.xlu0 %1241 }
 0x39c   : > { %3463 = vpow2.f32 %v1285_v56  ;;  %v1267_v60 = vsub.f32 %v3116_v11, %v1242_v59 }
 0x39d   : > { %3465 = vpow2.f32 %v1283_v58 }
 0x39e   : > { %v4587_v61 = vpop.eup %3457  ;;  %v1289_v62 = vmul.f32 1.442695, %v1267_v60 }
 0x39f   : > { %v1244_v63 = vpop.xlane.xlu0 %1243  ;;  %1309 = vadd.xlane.f32.xlu1 %v4587_v61  ;;  %v4590_v0 = vpop.eup %3459 }
 0x3a0   : > { %3467 = vpow2.f32 %v1289_v62  ;;  %v1268_v10 = vsub.f32 %v4530_v13, %v1244_v63 }
 0x3a2   : > { %v1291_v40 = vmul.f32 1.442695, %v1268_v10 }
 0x3a3   : > { %v1246_v1 = vpop.xlane.xlu0 %1245  ;;  %1313 = vadd.xlane.f32.xlu1 %v4590_v0 }
 0x3a4   : > { %v1269_v2 = vsub.f32 %v4536_v16, %v1246_v1 }
 0x3a5   : > { %v4594_v3 = vpop.eup %3461 }
 0x3a6   : > { %v4596_v4 = vpop.eup %3463  ;;  %v1293_v5 = vmul.f32 1.442695, %v1269_v2  ;;  %1311 = vadd.xlane.f32.xlu0 %v4594_v3 }
 0x3a7   : > { %1317 = vadd.xlane.f32.xlu1 %v4596_v4  ;;  %v4600_v6 = vpop.eup %3465  ;;  %v1248_v9 = vpop.xlane.xlu0 %1247 }
 0x3a8   : > { %3469 = vpow2.f32 %v1293_v5  ;;  %v1270_v41 = vsub.f32 %v4541_v18, %v1248_v9 }
 0x3aa   : > { %v4602_v7 = vpop.eup %3467  ;;  %1315 = vadd.xlane.f32.xlu0 %v4600_v6  ;;  %v1295_v46 = vmul.f32 1.442695, %v1270_v41 }
 0x3ab   : > { %1321 = vadd.xlane.f32.xlu1 %v4602_v7  ;;  %v1252_v16 = vpop.xlane.xlu0 %1251 }
 0x3ac   : > { %v1272_v48 = vsub.f32 %v4539_v17, %v1252_v16 }
 0x3ae   : > { %v1299_v51 = vmul.f32 1.442695, %v1272_v48 }
 0x3af   : > { %v1256_v49 = vpop.xlane.xlu0 %1255 }
 0x3b0   : > { %v1274_v18 = vsub.f32 %v4553_v22, %v1256_v49 }
 0x3b2   : > { %v4606_v8 = vpop.eup %3469  ;;  %v1303_v17 = vmul.f32 1.442695, %v1274_v18 }
 0x3b3   : > { %1325 = vadd.xlane.f32.xlu1 %v4606_v8 }
 0x3cb   : > { %v1240_v11 = vpop.xlane.xlu1 %1239 }
 0x3cc   : > { %v1266_v12 = vsub.f32 %v4532_v14, %v1240_v11 }
 0x3ce   : > { %v1287_v39 = vmul.f32 1.442695, %v1266_v12 }
 0x3cf   : > { %v1250_v42 = vpop.xlane.xlu1 %1249 }
 0x3d0   : > { %3471 = vpow2.f32 %v1287_v39  ;;  %v1271_v43 = vsub.f32 %v4534_v15, %v1250_v42  ;;  %v1260_v15 = vpop.xlane.xlu0 %1259 }
 0x3d1   : > { %3473 = vpow2.f32 %v1291_v40  ;;  %v1276_v58 = vsub.f32 %v4551_v21, %v1260_v15 }
 0x3d2   : > { %v1297_v45 = vmul.f32 1.442695, %v1271_v43 }
 0x3d3   : > { %v1254_v50 = vpop.xlane.xlu1 %1253 }
 0x3d4   : > { %3475 = vpow2.f32 %v1297_v45  ;;  %v1273_v13 = vsub.f32 %v4546_v20, %v1254_v50 }
 0x3d5   : > { %3477 = vpow2.f32 %v1295_v46 }
 0x3d6   : > { %v1301_v14 = vmul.f32 1.442695, %v1273_v13 }
 0x3d7   : > { %v1258_v53 = vpop.xlane.xlu1 %1257 }
 0x3d8   : > { %3479 = vpow2.f32 %v1301_v14  ;;  %v1275_v55 = vsub.f32 %v4544_v19, %v1258_v53  ;;  %v1307_v19 = vmul.f32 1.442695, %v1276_v58  ;;  %v1021_v53 = vld [vmem:[#allocation15 + $0x10] sm:$0xff] }
 0x3d9   : > { %3481 = vpow2.f32 %v1299_v51  ;;  %v1020_v51 = vld [vmem:[#allocation15 + $0x8] sm:$0xff] }
 0x3da   : > { %v4617_v56 = vpop.eup %3471  ;;  %v1305_v57 = vmul.f32 1.442695, %v1275_v55  ;;  %v1022_v55 = vld [vmem:[#allocation15 + $0x18] sm:$0xff] }
 0x3db   : > { %1319 = vadd.xlane.f32.xlu0 %v4617_v56  ;;  %v4621_v20 = vpop.eup %3473 }
 0x3dc   : > { %3483 = vpow2.f32 %v1305_v57  ;;  %v1036_v57 = vpack.c.bf16 %v1022_v55, %v1021_v53  ;;  %v1026_v53 = vld [vmem:[#allocation15 + $0x38] sm:$0xff] }
 0x3dd   : > { %3485 = vpow2.f32 %v1303_v17 }
 0x3de   : > { %v4623_v59 = vpop.eup %3475  ;;  %3487 = vpow2.f32 %v1307_v19 }
 0x3df   : > { %1329 = vadd.xlane.f32.xlu1 %v4623_v59  ;;  %1323 = vadd.xlane.f32.xlu0 %v4621_v20  ;;  %v4627_v22 = vpop.eup %3477 }
 0x3e2   : > { %v4629_v60 = vpop.eup %3479 }
 0x3e3   : > { %1333 = vadd.xlane.f32.xlu1 %v4629_v60  ;;  %1327 = vadd.xlane.f32.xlu0 %v4627_v22  ;;  %v4633_v21 = vpop.eup %3481 }
 0x3e6   : > { %v4635_v62 = vpop.eup %3483 }
 0x3e7   : > { %1337 = vadd.xlane.f32.xlu1 %v4635_v62  ;;  %1331 = vadd.xlane.f32.xlu0 %v4633_v21  ;;  %v4639_v63 = vpop.eup %3485 }
 0x3e8   : > { %v4643_v1 = vpop.eup %3487 }
 0x3eb   : > { %1335 = vadd.xlane.f32.xlu0 %v4639_v63  ;;  %1848 = vmax.xlane.f32.xlu1 %v4564_v25 }
 0x3ef   : > { %1339 = vadd.xlane.f32.xlu0 %v4643_v1  ;;  %1852 = vmax.xlane.f32.xlu1 %v4562_v23 }
 0x3f3   : > { %1850 = vmax.xlane.f32.xlu0 %v4568_v28  ;;  %1856 = vmax.xlane.f32.xlu1 %v4572_v30 }
 0x3f7   : > { %1854 = vmax.xlane.f32.xlu0 %v4566_v26  ;;  %1860 = vmax.xlane.f32.xlu1 %v4570_v29 }
 0x3fb   : > { %1858 = vmax.xlane.f32.xlu0 %v4576_v32  ;;  %1864 = vmax.xlane.f32.xlu1 %v4580_v34 }
 0x3ff   : > { %1862 = vmax.xlane.f32.xlu0 %v4574_v31  ;;  %1868 = vmax.xlane.f32.xlu1 %v4578_v33 }
 0x403   : > { %1866 = vmax.xlane.f32.xlu0 %v4584_v38 }
 0x407   : > { %1870 = vmax.xlane.f32.xlu0 %v4582_v36 }
 0x42c   : > { %v1310_v2 = vpop.xlane.xlu1 %1309 }
 0x42d   : > { %3489 = vrcp.f32 %v1310_v2 }
 0x430   : > { %v1314_v5 = vpop.xlane.xlu1 %1313 }
 0x431   : > { %3491 = vrcp.f32 %v1314_v5 }
 0x433   : > { %v1312_v9 = vpop.xlane.xlu0 %1311 }
 0x434   : > { %3493 = vrcp.f32 %v1312_v9  ;;  %v1318_v10 = vpop.xlane.xlu1 %1317 }
 0x435   : > { %3495 = vrcp.f32 %v1318_v10 }
 0x437   : > { %v3490_v11 = vpop.eup %3489  ;;  %v1316_v12 = vpop.xlane.xlu0 %1315 }
 0x438   : > { %3497 = vrcp.f32 %v1316_v12  ;;  %v1322_v16 = vpop.xlane.xlu1 %1321  ;;  %v1357_v39 = vmul.f32 %v3490_v11, %v4587_v61 }
 0x439   : > { %3499 = vrcp.f32 %v1322_v16 }
 0x43a   : > { %1373 = vst [vmem:[%s4659_s12] sm:$0xff] %v1357_v39 }
 0x43b   : > { %v3492_v40 = vpop.eup %3491 }
 0x43c   : > { %v1359_v41 = vmul.f32 %v3492_v40, %v4590_v0 }
 0x43e   : > { %v3494_v42 = vpop.eup %3493  ;;  %1375 = vst [vmem:[%s4659_s12 + $0x10] sm:$0xff] %v1359_v41 }
 0x43f   : > { %v3496_v43 = vpop.eup %3495  ;;  %v1358_v45 = vmul.f32 %v3494_v42, %v4594_v3  ;;  %v1019_v3 = vld [vmem:[#allocation15] sm:$0xff] }
 0x440   : > { %v1326_v46 = vpop.xlane.xlu1 %1325  ;;  %v1361_v61 = vmul.f32 %v3496_v43, %v4596_v4  ;;  %v1035_v18 = vpack.c.bf16 %v1020_v51, %v1019_v3 }
 0x441   : > { %3501 = vrcp.f32 %v1326_v46  ;;  %1374 = vst [vmem:[%s4659_s12 + $0x8] sm:$0xff] %v1358_v45  ;;  %v1389_v48 = vpack.c.bf16 %v1358_v45, %v1357_v39 }
 0x442   : > { %v3498_v49 = vpop.eup %3497  ;;  %1377 = vst [vmem:[%s4659_s12 + $0x20] sm:$0xff] %v1361_v61  ;;  %3158 = vmatprep.subr.bf16.mxu0 %v1035_v18 }
 0x443   : > { %v3500_v50 = vpop.eup %3499  ;;  %v1360_v13 = vmul.f32 %v3498_v49, %v4600_v6  ;;  %3142 = vmatprep.mubr.bf16.mxu0 %v1389_v48 }
 0x444   : > { %v1363_v0 = vmul.f32 %v3500_v50, %v4602_v7 }
 0x445   : > { %1376 = vst [vmem:[%s4659_s12 + $0x18] sm:$0xff] %v1360_v13  ;;  %v1390_v14 = vpack.c.bf16 %v1360_v13, %v1359_v41  ;;  %v1023_v13 = vld [vmem:[#allocation15 + $0x20] sm:$0xff] }
 0x446   : > { %1379 = vst [vmem:[%s4659_s12 + $0x30] sm:$0xff] %v1363_v0 }
 0x447   : > { %3143 = vmatmul.mubr.bf16.vlgmr.msra.gmra.mrb[32].mxu0 %v1390_v14 }
 0x448   : > { %3159 = vmatpush3.bf16.msra.mxu0 %v1035_v18 }
 0x449   : > { %3160 = vmatprep.subr.bf16.mxu0 %v1036_v57 }
 0x44b   : > { %v3502_v4 = vpop.eup %3501 }
 0x44c   : > { %v1365_v15 = vmul.f32 %v3502_v4, %v4606_v8  ;;  %3161 = vmatpush3.bf16.msra.mxu0 %v1036_v57 }
 0x44e   : > { %1381 = vst [vmem:[%s4659_s12 + $0x40] sm:$0xff] %v1365_v15 }
 0x468   : > { %v1320_v6 = vpop.xlane.xlu0 %1319 }
 0x469   : > { %3503 = vrcp.f32 %v1320_v6 }
 0x46c   : > { %v1330_v7 = vpop.xlane.xlu1 %1329  ;;  %v1324_v17 = vpop.xlane.xlu0 %1323 }
 0x46d   : > { %3505 = vrcp.f32 %v1330_v7 }
 0x46e   : > { %3507 = vrcp.f32 %v1324_v17  ;;  %v4674_v58 = vpop.f32.mrb[44].mxu1 }
 0x46f   : > { %v4676_v19 = vpop.f32.mrb[45].mxu1 }
 0x470   : > { %v1334_v2 = vpop.xlane.xlu1 %1333  ;;  %v1328_v5 = vpop.xlane.xlu0 %1327  ;;  %1872 = vmax.xlane.f32.xlu1 %v4676_v19 }
 0x471   : > { %3509 = vrcp.f32 %v1334_v2  ;;  %v4679_v8 = vpop.f32.mrb[46].mxu1 }
 0x472   : > { %3511 = vrcp.f32 %v1328_v5  ;;  %v4681_v9 = vpop.f32.mrb[47].mxu1 }
 0x473   : > { %v3504_v10 = vpop.eup %3503  ;;  %1874 = vmax.xlane.f32.xlu0 %v4681_v9 }
 0x474   : > { %v1338_v11 = vpop.xlane.xlu1 %1337  ;;  %v1332_v12 = vpop.xlane.xlu0 %1331  ;;  %1876 = vmax.xlane.f32.xlu1 %v4674_v58  ;;  %v1362_v16 = vmul.f32 %v3504_v10, %v4617_v56 }
 0x475   : > { %3513 = vrcp.f32 %v1338_v11 }
 0x476   : > { %3515 = vrcp.f32 %v1332_v12  ;;  %1378 = vst [vmem:[%s4659_s12 + $0x28] sm:$0xff] %v1362_v16  ;;  %v1391_v39 = vpack.c.bf16 %v1362_v16, %v1361_v61 }
 0x477   : > { %v3506_v40 = vpop.eup %3505  ;;  %1878 = vmax.xlane.f32.xlu0 %v4679_v8 }
 0x478   : > { %v3508_v41 = vpop.eup %3507  ;;  %3146 = vmatprep.mubr.bf16.mxu0 %v1391_v39  ;;  %v1336_v42 = vpop.xlane.xlu0 %1335  ;;  %v1367_v43 = vmul.f32 %v3506_v40, %v4623_v59  ;;  %v1024_v59 = vld [vmem:[#allocation15 + $0x28] sm:$0xff] }
 0x479   : > { %3517 = vrcp.f32 %v1336_v42  ;;  %v1364_v45 = vmul.f32 %v3508_v41, %v4621_v20  ;;  %v1037_v3 = vpack.c.bf16 %v1024_v59, %v1023_v13 }
 0x47a   : > { %1383 = vst [vmem:[%s4659_s12 + $0x50] sm:$0xff] %v1367_v43 }
 0x47b   : > { %v3510_v46 = vpop.eup %3509  ;;  %1380 = vst [vmem:[%s4659_s12 + $0x38] sm:$0xff] %v1364_v45  ;;  %v1392_v56 = vpack.c.bf16 %v1364_v45, %v1363_v0  ;;  %3162 = vmatprep.subr.bf16.mxu0 %v1037_v3 }
 0x47c   : > { %v3512_v48 = vpop.eup %3511  ;;  %v1340_v49 = vpop.xlane.xlu0 %1339  ;;  %v1369_v61 = vmul.f32 %v3510_v46, %v4629_v60  ;;  %3163 = vmatpush3.bf16.msra.mxu0 %v1037_v3 }
 0x47d   : > { %3147 = vmatmul.mubr.bf16.gmra.mrb[36].mxu0 %v1392_v56  ;;  %v1366_v50 = vmul.f32 %v3512_v48, %v4627_v22  ;;  %3519 = vrcp.f32 %v1340_v49  ;;  %v1025_v22 = vld [vmem:[#allocation15 + $0x30] sm:$0xff] }
 0x47e   : > { %1385 = vst [vmem:[%s4659_s12 + $0x60] sm:$0xff] %v1369_v61  ;;  %v1038_v55 = vpack.c.bf16 %v1026_v53, %v1025_v22 }
 0x47f   : > { %v3514_v14 = vpop.eup %3513  ;;  %1382 = vst [vmem:[%s4659_s12 + $0x48] sm:$0xff] %v1366_v50  ;;  %v1393_v20 = vpack.c.bf16 %v1366_v50, %v1365_v15 }
 0x480   : > { %v3516_v51 = vpop.eup %3515  ;;  %v1371_v0 = vmul.f32 %v3514_v14, %v4635_v62  ;;  %3164 = vmatprep.subr.bf16.mxu0 %v1038_v55 }
 0x481   : > { %3150 = vmatprep.mubr.bf16.mxu0 %v1393_v20  ;;  %v1368_v60 = vmul.f32 %v3516_v51, %v4633_v21  ;;  %3165 = vmatpush3.bf16.msra.mxu0 %v1038_v55 }
 0x482   : > { %1387 = vst [vmem:[%s4659_s12 + $0x70] sm:$0xff] %v1371_v0 }
 0x483   : > { %v3518_v4 = vpop.eup %3517  ;;  %1384 = vst [vmem:[%s4659_s12 + $0x58] sm:$0xff] %v1368_v60  ;;  %v1394_v18 = vpack.c.bf16 %v1368_v60, %v1367_v43 }
 0x484   : > { %v1370_v15 = vmul.f32 %v3518_v4, %v4639_v63  ;;  %v1849_v63 = vpop.xlane.xlu1 %1848 }
 0x485   : > { %3151 = vmatmul.mubr.bf16.gmra.mrb[40].mxu0 %v1394_v18  ;;  %2025 = vrot.lane.b32.xlu1 %v4466_v27, %s3972_s19 }
 0x486   : > { %1386 = vst [vmem:[%s4659_s12 + $0x68] sm:$0xff] %v1370_v15  ;;  %v1395_v62 = vpack.c.bf16 %v1370_v15, %v1369_v61 }
 0x487   : > { %v3520_v21 = vpop.eup %3519 }
 0x488   : > { %3154 = vmatprep.mubr.bf16.mxu0 %v1395_v62  ;;  %v1372_v57 = vmul.f32 %v3520_v21, %v4643_v1  ;;  %v1853_v27 = vpop.xlane.xlu1 %1852 }
 0x489   : > { %2027 = vrot.lane.b32.xlu1 %v4462_v24, %s3972_s19  ;;  %v1851_v24 = vpop.xlane.xlu0 %1850 }
 0x48a   : > { %1388 = vst [vmem:[%s4659_s12 + $0x78] sm:$0xff] %v1372_v57  ;;  %v1396_v6 = vpack.c.bf16 %v1372_v57, %v1371_v0 }
 0x48c   : > { %v1857_v1 = vpop.xlane.xlu1 %1856 }
 0x48d   : > { %3155 = vmatmul.mubr.bf16.gmra.mrb[44].mxu0 %v1396_v6  ;;  %2029 = vrot.lane.b32.xlu0 %v4487_v37, %s3972_s19  ;;  %v1855_v7 = vpop.xlane.xlu0 %1854  ;;  %v1882_v37 = vsub.f32 %v4562_v23, %v1853_v27  ;;  %v1884_v11 = vsub.f32 %v4572_v30, %v1857_v1 }
 0x48e   : > { %2031 = vrot.lane.b32.xlu1 %v4485_v35, %s3972_s19  ;;  %v1880_v35 = vsub.f32 %v4564_v25, %v1849_v63 }
 0x48f   : > { %v1900_v10 = vmul.f32 1.442695, %v1882_v37  ;;  %v1904_v39 = vmul.f32 1.442695, %v1884_v11 }
 0x490   : > { %v1861_v17 = vpop.xlane.xlu1 %1860  ;;  %v1896_v16 = vmul.f32 1.442695, %v1880_v35 }
 0x491   : > { %2033 = vrot.lane.b32.xlu0 %v4497_v47, %s3972_s19  ;;  %v1859_v2 = vpop.xlane.xlu0 %1858  ;;  %v1886_v5 = vsub.f32 %v4570_v29, %v1861_v17  ;;  %3521 = vpow2.f32 %v1900_v10  ;;  %v1881_v29 = vsub.f32 %v4568_v28, %v1851_v24 }
 0x492   : > { %2037 = vrot.lane.b32.xlu1 %v4508_v54, %s3972_s19  ;;  %v1885_v45 = vsub.f32 %v4576_v32, %v1859_v2 }
 0x493   : > { %v1908_v54 = vmul.f32 1.442695, %v1886_v5  ;;  %v1898_v43 = vmul.f32 1.442695, %v1881_v29 }
 0x494   : > { %v1865_v47 = vpop.xlane.xlu1 %1864  ;;  %v1906_v48 = vmul.f32 1.442695, %v1885_v45 }
 0x495   : > { %2035 = vrot.lane.b32.xlu0 %v4494_v44, %s3972_s19  ;;  %v1863_v12 = vpop.xlane.xlu0 %1862  ;;  %v1883_v44 = vsub.f32 %v4566_v26, %v1855_v7  ;;  %3523 = vpow2.f32 %v1908_v54  ;;  %v1888_v26 = vsub.f32 %v4580_v34, %v1865_v47 }
 0x496   : > { %v1887_v40 = vsub.f32 %v4574_v31, %v1863_v12  ;;  %3525 = vpow2.f32 %v1896_v16 }
 0x497   : > { %v1902_v41 = vmul.f32 1.442695, %v1883_v44  ;;  %3527 = vpow2.f32 %v1904_v39  ;;  %v1912_v32 = vmul.f32 1.442695, %v1888_v26 }
 0x498   : > { %v1869_v23 = vpop.xlane.xlu1 %1868  ;;  %v1910_v42 = vmul.f32 1.442695, %v1887_v40 }
 0x499   : > { %v1867_v25 = vpop.xlane.xlu0 %1866  ;;  %v1890_v30 = vsub.f32 %v4578_v33, %v1869_v23  ;;  %3529 = vpow2.f32 %v1902_v41 }
 0x49a   : > { %3531 = vpow2.f32 %v1910_v42  ;;  %v1889_v49 = vsub.f32 %v4584_v38, %v1867_v25 }
 0x49b   : > { %v4727_v46 = vpop.eup %3521  ;;  %v1916_v31 = vmul.f32 1.442695, %v1890_v30  ;;  %3533 = vpow2.f32 %v1898_v43 }
 0x49c   : > { %v1914_v50 = vmul.f32 1.442695, %v1889_v49 }
 0x49d   : > { %v1871_v56 = vpop.xlane.xlu0 %1870  ;;  %3535 = vpow2.f32 %v1916_v31 }
 0x49e   : > { %v1891_v61 = vsub.f32 %v4582_v36, %v1871_v56  ;;  %3537 = vpow2.f32 %v1906_v48 }
 0x49f   : > { %v4731_v28 = vpop.eup %3523  ;;  %3539 = vpow2.f32 %v1912_v32 }
 0x4a0   : > { %v4735_v33 = vpop.eup %3525  ;;  %v1918_v38 = vmul.f32 1.442695, %v1891_v61  ;;  %3541 = vpow2.f32 %v1914_v50 }
 0x4a1   : > { %v4739_v34 = vpop.eup %3527 }
 0x4a2   : > { %3543 = vpow2.f32 %v1918_v38 }
 0x4a3   : > { %v4742_v13 = vpop.eup %3529 }
 0x4a4   : > { %v4745_v59 = vpop.eup %3531 }
 0x4a5   : > { %v4748_v36 = vpop.eup %3533 }
 0x4a7   : > { %v4751_v14 = vpop.eup %3535 }
 0x4a8   : > { %v4754_v20 = vpop.eup %3537 }
 0x4a9   : > { %v4757_v3 = vpop.eup %3539 }
 0x4aa   : > { %v4760_v51 = vpop.eup %3541 }
 0x4ac   : > { %v4763_v0 = vpop.eup %3543 }
 0x4b4   : > { %1932 = vadd.xlane.f32.xlu0 %v4727_v46 }
 0x4b6   : > { %1940 = vadd.xlane.f32.xlu1 %v4731_v28 }
 0x4b8   : > { %1928 = vadd.xlane.f32.xlu0 %v4735_v33 }
 0x4ba   : > { %1936 = vadd.xlane.f32.xlu1 %v4739_v34 }
 0x4bc   : > { %1934 = vadd.xlane.f32.xlu0 %v4742_v13 }
 0x4be   : > { %1942 = vadd.xlane.f32.xlu1 %v4745_v59 }
 0x4c0   : > { %1930 = vadd.xlane.f32.xlu0 %v4748_v36 }
 0x4c2   : > { %1948 = vadd.xlane.f32.xlu1 %v4751_v14 }
 0x4c4   : > { %1938 = vadd.xlane.f32.xlu0 %v4754_v20 }
 0x4c6   : > { %1944 = vadd.xlane.f32.xlu1 %v4757_v3 }
 0x4c8   : > { %1946 = vadd.xlane.f32.xlu0 %v4760_v51 }
 0x4ca   : > { %1950 = vadd.xlane.f32.xlu1 %v4763_v0 }
 0x4fd   : > { %v1873_v60 = vpop.xlane.xlu1 %1872 }
 0x4fe   : > { %v1892_v22 = vsub.f32 %v4676_v19, %v1873_v60 }
 0x500   : > { %v1920_v53 = vmul.f32 1.442695, %v1892_v22  ;;  %v1875_v4 = vpop.xlane.xlu0 %1874 }
 0x501   : > { %v1877_v18 = vpop.xlane.xlu1 %1876  ;;  %v1893_v55 = vsub.f32 %v4681_v9, %v1875_v4 }
 0x502   : > { %3545 = vpow2.f32 %v1920_v53  ;;  %v1894_v15 = vsub.f32 %v4674_v58, %v1877_v18 }
 0x503   : > { %v1922_v63 = vmul.f32 1.442695, %v1893_v55 }
 0x504   : > { %v1924_v62 = vmul.f32 1.442695, %v1894_v15  ;;  %v1879_v21 = vpop.xlane.xlu0 %1878 }
 0x505   : > { %v1895_v57 = vsub.f32 %v4679_v8, %v1879_v21  ;;  %v2026_v6 = vpop.permute.xlu1 %2025 }
 0x506   : > { %3547 = vpow2.f32 %v1924_v62  ;;  %3214 = vmatprep.subr.bf16.mxu0 %v2026_v6  ;;  %3270 = vmatprep.subr.bf16.mxu1 %v2026_v6 }
 0x507   : > { %v1926_v27 = vmul.f32 1.442695, %v1895_v57  ;;  %3278 = vmatpush3.bf16.msra.mxu1 %v2026_v6 }
 0x508   : > { %v2030_v24 = vpop.permute.xlu0 %2029 }
 0x509   : > { %3549 = vpow2.f32 %v1926_v27  ;;  %v2028_v19 = vpop.permute.xlu1 %2027 }
 0x50a   : > { %3551 = vpow2.f32 %v1922_v63  ;;  %3271 = vmatprep.subr.bf16.mxu1 %v2028_v19 }
 0x50b   : > { %3279 = vmatpush3.bf16.msra.mxu1 %v2028_v19 }
 0x50c   : > { %v4770_v9 = vpop.eup %3545  ;;  %3272 = vmatprep.subr.bf16.mxu1 %v2030_v24  ;;  %v2034_v1 = vpop.permute.xlu0 %2033 }
 0x50d   : > { %1952 = vadd.xlane.f32.xlu1 %v4770_v9  ;;  %v2032_v58 = vpop.permute.xlu1 %2031 }
 0x50f   : > { %3280 = vmatpush3.bf16.msra.mxu1 %v2030_v24 }
 0x510   : > { %v4773_v8 = vpop.eup %3547  ;;  %3273 = vmatprep.subr.bf16.mxu1 %v2032_v58  ;;  %v2036_v37 = vpop.permute.xlu0 %2035 }
 0x511   : > { %1956 = vadd.xlane.f32.xlu0 %v4773_v8  ;;  %v2038_v5 = vpop.permute.xlu1 %2037 }
 0x513   : > { %v4776_v7 = vpop.eup %3549  ;;  %3281 = vmatpush3.bf16.msra.mxu1 %v2032_v58 }
 0x514   : > { %v4778_v17 = vpop.eup %3551  ;;  %1958 = vadd.xlane.f32.xlu1 %v4776_v7  ;;  %3274 = vmatprep.subr.bf16.mxu1 %v2034_v1 }
 0x515   : > { %1954 = vadd.xlane.f32.xlu0 %v4778_v17 }
 0x517   : > { %3282 = vmatpush3.bf16.msra.mxu1 %v2034_v1 }
 0x518   : > { %3275 = vmatprep.subr.bf16.mxu1 %v2036_v37 }
 0x51a   : > { %v3144_v2 = vpop.f32.mrb[32].mxu0 }
 0x51b   : > { %v1431_v35 = vpop.f32.mrb[33].mxu0  ;;  %3283 = vmatpush3.bf16.msra.mxu1 %v2036_v37 }
 0x51c   : > { %v3145_v10 = vpop.f32.mrb[34].mxu0  ;;  %3276 = vmatprep.subr.bf16.mxu1 %v2038_v5 }
 0x51d   : > { %v1495_v47 = vpack.c.bf16 %v3145_v10, %v3144_v2  ;;  %v1434_v11 = vpop.f32.mrb[35].mxu0 }
 0x51e   : > { %v1494_v54 = vpack.c.bf16 %v1434_v11, %v1431_v35 }
 0x51f   : > { %3284 = vmatpush3.bf16.msra.mxu1 %v2038_v5 }
 0x520   : > { %3166 = vmatprep.mubr.msk.bf16.mxu0 %vm1083_vm0, %v1494_v54 }
 0x521   : > { %3167 = vmatmul.mubr.msk.bf16.vlgmr.msra.gmra.mrb[48].mxu0 %vm1083_vm0, %v1495_v47 }
 0x522   : > { %3215 = vmatpush3.bf16.msra.mxu0 %v2026_v6 }
 0x523   : > { %3216 = vmatprep.subr.bf16.mxu0 %v2028_v19 }
 0x526   : > { %3217 = vmatpush3.bf16.msra.mxu0 %v2028_v19 }
 0x527   : > { %3218 = vmatprep.subr.bf16.mxu0 %v2030_v24 }
 0x52a   : > { %3219 = vmatpush3.bf16.msra.mxu0 %v2030_v24 }
 0x52b   : > { %3220 = vmatprep.subr.bf16.mxu0 %v2032_v58  ;;  %2039 = vrot.lane.b32.xlu0 %v4504_v52, %s3972_s19 }
 0x52e   : > { %3221 = vmatpush3.bf16.msra.mxu0 %v2032_v58 }
 0x52f   : > { %3222 = vmatprep.subr.bf16.mxu0 %v2034_v1 }
 0x532   : > { %3223 = vmatpush3.bf16.msra.mxu0 %v2034_v1 }
 0x533   : > { %3224 = vmatprep.subr.bf16.mxu0 %v2036_v37 }
 0x536   : > { %3225 = vmatpush3.bf16.msra.mxu0 %v2036_v37 }
 0x537   : > { %3226 = vmatprep.subr.bf16.mxu0 %v2038_v5 }
 0x53a   : > { %3227 = vmatpush3.bf16.msra.mxu0 %v2038_v5 }
 0x541   : > { %v1933_v12 = vpop.xlane.xlu0 %1932 }
 0x542   : > { %3553 = vrcp.f32 %v1933_v12 }
 0x543   : > { %v1941_v16 = vpop.xlane.xlu1 %1940 }
 0x544   : > { %3555 = vrcp.f32 %v1941_v16 }
 0x545   : > { %v1929_v44 = vpop.xlane.xlu0 %1928 }
 0x546   : > { %3557 = vrcp.f32 %v1929_v44 }
 0x547   : > { %v1937_v39 = vpop.xlane.xlu1 %1936 }
 0x548   : > { %3559 = vrcp.f32 %v1937_v39 }
 0x549   : > { %v1935_v40 = vpop.xlane.xlu0 %1934 }
 0x54a   : > { %3561 = vrcp.f32 %v1935_v40  ;;  %v1027_v40 = vld [vmem:[#allocation15 + $0x40] sm:$0xff] }
 0x54b   : > { %v1943_v23 = vpop.xlane.xlu1 %1942 }
 0x54c   : > { %v3554_v52 = vpop.eup %3553  ;;  %3563 = vrcp.f32 %v1943_v23  ;;  %v1028_v23 = vld [vmem:[#allocation15 + $0x48] sm:$0xff] }
 0x54d   : > { %v4787_v29 = vmul.f32 %v3554_v52, %v4727_v46  ;;  %v1931_v41 = vpop.xlane.xlu0 %1930 }
 0x54e   : > { %v3556_v25 = vpop.eup %3555  ;;  %3565 = vrcp.f32 %v1931_v41  ;;  %v1039_v41 = vpack.c.bf16 %v1028_v23, %v1027_v40 }
 0x54f   : > { %2825 = vst [vmem:[%s4659_s12 + $0x90] sm:$0xff] %v4787_v29  ;;  %v1949_v42 = vpop.xlane.xlu1 %1948  ;;  %v4792_v30 = vmul.f32 %v3556_v25, %v4731_v28 }
 0x550   : > { %v3558_v43 = vpop.eup %3557  ;;  %3567 = vrcp.f32 %v1949_v42  ;;  %v3148_v45 = vpop.f32.mrb[36].mxu0 }
 0x551   : > { %v1447_v26 = vpop.f32.mrb[37].mxu0  ;;  %v1939_v31 = vpop.xlane.xlu0 %1938  ;;  %v4795_v56 = vmul.f32 %v3558_v43, %v4735_v33  ;;  %2829 = vst [vmem:[%s4659_s12 + $0xb0] sm:$0xff] %v4792_v30  ;;  %v1029_v43 = vld [vmem:[#allocation15 + $0x50] sm:$0xff] }
 0x552   : > { %v3560_v46 = vpop.eup %3559  ;;  %3569 = vrcp.f32 %v1939_v31  ;;  %v3149_v48 = vpop.f32.mrb[38].mxu0 }
 0x553   : > { %v1497_v49 = vpack.c.bf16 %v3149_v48, %v3148_v45  ;;  %v1450_v32 = vpop.f32.mrb[39].mxu0  ;;  %v1945_v61 = vpop.xlane.xlu1 %1944  ;;  %2823 = vst [vmem:[%s4659_s12 + $0x80] sm:$0xff] %v4795_v56  ;;  %v4802_v28 = vmul.f32 %v3560_v46, %v4739_v34  ;;  %v1030_v45 = vld [vmem:[#allocation15 + $0x58] sm:$0xff]  ;;  %v1031_v46 = vld [vmem:[#allocation15 + $0x60] sm:$0xff]  ;;  %v1032_v48 = vld [vmem:[#allocation15 + $0x68] sm:$0xff] }
 0x554   : > { %v3562_v50 = vpop.eup %3561  ;;  %v1496_v38 = vpack.c.bf16 %v1450_v32, %v1447_v26  ;;  %3571 = vrcp.f32 %v1945_v61  ;;  %v1040_v31 = vpack.c.bf16 %v1030_v45, %v1029_v43  ;;  %v1041_v61 = vpack.c.bf16 %v1032_v48, %v1031_v46  ;;  %v3623_v45 = vld [vmem:[%s4355_s10 + $0x38] sm:$0xff]  ;;  %v3625_v48 = vld [vmem:[%s4355_s10 + $0x70] sm:$0xff] }
 0x555   : > { %v4805_v33 = vmul.f32 %v3562_v50, %v4742_v13  ;;  %v1947_v60 = vpop.xlane.xlu0 %1946  ;;  %2827 = vst [vmem:[%s4659_s12 + $0xa0] sm:$0xff] %v4802_v28 }
 0x556   : > { %v3564_v22 = vpop.eup %3563  ;;  %3573 = vrcp.f32 %v1947_v60  ;;  %3170 = vmatprep.mubr.msk.bf16.mxu0 %vm1083_vm0, %v1496_v38  ;;  %v1034_v38 = vld [vmem:[#allocation15 + $0x78] sm:$0xff] }
 0x557   : > { %2826 = vst [vmem:[%s4659_s12 + $0x98] sm:$0xff] %v4805_v33  ;;  %3171 = vmatmul.mubr.msk.bf16.gmra.mrb[52].mxu0 %vm1083_vm0, %v1497_v49  ;;  %v1951_v34 = vpop.xlane.xlu1 %1950  ;;  %v2010_v53 = vpack.c.bf16 %v4805_v33, %v4787_v29  ;;  %v4816_v13 = vmul.f32 %v3564_v22, %v4745_v59  ;;  %v1033_v29 = vld [vmem:[#allocation15 + $0x70] sm:$0xff] }
 0x558   : > { %v3566_v4 = vpop.eup %3565  ;;  %3575 = vrcp.f32 %v1951_v34  ;;  %v3152_v18 = vpop.f32.mrb[40].mxu0 }
 0x559   : > { %v1463_v55 = vpop.f32.mrb[41].mxu0  ;;  %v1977_v15 = vmul.f32 %v3566_v4, %v4748_v36  ;;  %2830 = vst [vmem:[%s4659_s12 + $0xb8] sm:$0xff] %v4816_v13  ;;  %v2012_v62 = vpack.c.bf16 %v4816_v13, %v4792_v30 }
 0x55a   : > { %v3568_v21 = vpop.eup %3567  ;;  %v3153_v57 = vpop.f32.mrb[42].mxu0 }
 0x55b   : > { %v1986_v6 = vmul.f32 %v3568_v21, %v4751_v14  ;;  %v1499_v63 = vpack.c.bf16 %v3153_v57, %v3152_v18  ;;  %v1466_v59 = vpop.f32.mrb[43].mxu0  ;;  %2824 = vst [vmem:[%s4659_s12 + $0x88] sm:$0xff] %v1977_v15  ;;  %v2009_v16 = vpack.c.bf16 %v1977_v15, %v4795_v56 }
 0x55c   : > { %v3570_v27 = vpop.eup %3569  ;;  %v1498_v19 = vpack.c.bf16 %v1466_v59, %v1463_v55 }
 0x55d   : > { %2833 = vst [vmem:[%s4659_s12 + $0xd0] sm:$0xff] %v1986_v6  ;;  %v1981_v24 = vmul.f32 %v3570_v27, %v4754_v20 }
 0x55e   : > { %v3572_v36 = vpop.eup %3571  ;;  %3174 = vmatprep.mubr.msk.bf16.mxu0 %vm1083_vm0, %v1498_v19 }
 0x55f   : > { %3175 = vmatmul.mubr.msk.bf16.gmra.mrb[56].mxu0 %vm1083_vm0, %v1499_v63  ;;  %v1984_v58 = vmul.f32 %v3572_v36, %v4757_v3  ;;  %2828 = vst [vmem:[%s4659_s12 + $0xa8] sm:$0xff] %v1981_v24  ;;  %v2011_v14 = vpack.c.bf16 %v1981_v24, %v4802_v28 }
 0x560   : > { %v3574_v1 = vpop.eup %3573  ;;  %v3156_v37 = vpop.f32.mrb[44].mxu0 }
 0x561   : > { %v1479_v2 = vpop.f32.mrb[45].mxu0  ;;  %v1985_v5 = vmul.f32 %v3574_v1, %v4760_v51  ;;  %2831 = vst [vmem:[%s4659_s12 + $0xc0] sm:$0xff] %v1984_v58 }
 0x562   : > { %v3576_v35 = vpop.eup %3575  ;;  %v3157_v20 = vpop.f32.mrb[46].mxu0 }
 0x563   : > { %v1987_v10 = vmul.f32 %v3576_v35, %v4763_v0  ;;  %v1501_v47 = vpack.c.bf16 %v3157_v20, %v3156_v37  ;;  %v1482_v11 = vpop.f32.mrb[47].mxu0  ;;  %2832 = vst [vmem:[%s4659_s12 + $0xc8] sm:$0xff] %v1985_v5  ;;  %v2013_v54 = vpack.c.bf16 %v1985_v5, %v1984_v58  ;;  %v3617_v37 = vld [vmem:[%s4355_s10 + $0x10] sm:$0xff] }
 0x564   : > { %v1500_v12 = vpack.c.bf16 %v1482_v11, %v1479_v2 }
 0x565   : > { %2834 = vst [vmem:[%s4659_s12 + $0xd8] sm:$0xff] %v1987_v10  ;;  %3238 = vmatprep.mubr.bf16.mxu1 %v2013_v54  ;;  %v2014_v3 = vpack.c.bf16 %v1987_v10, %v1986_v6  ;;  %v3618_v10 = vld [vmem:[%s4355_s10] sm:$0xff]  ;;  %v3619_v54 = vld [vmem:[%s4355_s10 + $0x18] sm:$0xff] }
 0x566   : > { %3178 = vmatprep.mubr.msk.bf16.mxu0 %vm1083_vm0, %v1500_v12 }
 0x567   : > { %3179 = vmatmul.mubr.msk.bf16.gmra.mrb[60].mxu0 %vm1083_vm0, %v1501_v47 }
 0x568   : > { %3230 = vmatprep.mubr.bf16.mxu0 %v2009_v16 }
 0x59a   : > { %v1953_v51 = vpop.xlane.xlu1 %1952 }
 0x59b   : > { %3577 = vrcp.f32 %v1953_v51 }
 0x59e   : > { %v1957_v44 = vpop.xlane.xlu0 %1956 }
 0x59f   : > { %3579 = vrcp.f32 %v1957_v44 }
 0x5a1   : > { %v1959_v0 = vpop.xlane.xlu1 %1958 }
 0x5a2   : > { %3581 = vrcp.f32 %v1959_v0  ;;  %v1955_v39 = vpop.xlane.xlu0 %1954 }
 0x5a3   : > { %3583 = vrcp.f32 %v1955_v39  ;;  %v3621_v39 = vld [vmem:[%s4355_s10 + $0x8] sm:$0xff] }
 0x5a5   : > { %v3578_v52 = vpop.eup %3577 }
 0x5a6   : > { %v2040_v25 = vpop.permute.xlu0 %2039  ;;  %v1988_v42 = vmul.f32 %v3578_v52, %v4770_v9  ;;  %v3622_v52 = vld [vmem:[%s4355_s10 + $0x20] sm:$0xff] }
 0x5a7   : > { %3228 = vmatprep.subr.bf16.mxu0 %v2040_v25  ;;  %3277 = vmatprep.subr.bf16.mxu1 %v2040_v25 }
 0x5a8   : > { %3229 = vmatpush3.bf16.msra.mxu0 %v2040_v25  ;;  %3285 = vmatpush3.bf16.msra.mxu1 %v2040_v25  ;;  %2835 = vst [vmem:[%s4659_s12 + $0xe0] sm:$0xff] %v1988_v42 }
 0x5a9   : > { %v3580_v26 = vpop.eup %3579  ;;  %3246 = vmatprep.subr.bf16.mxu0 %v1039_v41 }
 0x5aa   : > { %v1990_v56 = vmul.f32 %v3580_v26, %v4773_v8 }
 0x5ab   : > { %3231 = vmatmul.mubr.bf16.vlgmr.msra.gmra.mrb[64].mxu0 %v2010_v53  ;;  %3239 = vmatmul.mubr.bf16.vlgmr.msra.gmra.mrb[48].mxu1 %v2014_v3  ;;  %v3620_v3 = vld [vmem:[%s4355_s10 + $0x30] sm:$0xff] }
 0x5ac   : > { %v3582_v9 = vpop.eup %3581  ;;  %3234 = vmatprep.mubr.bf16.mxu0 %v2011_v14  ;;  %2837 = vst [vmem:[%s4659_s12 + $0xf0] sm:$0xff] %v1990_v56  ;;  %3247 = vmatpush3.bf16.msra.mxu0 %v1039_v41 }
 0x5ad   : > { %v3584_v49 = vpop.eup %3583  ;;  %v1991_v32 = vmul.f32 %v3582_v9, %v4776_v7  ;;  %3248 = vmatprep.subr.bf16.mxu0 %v1040_v31  ;;  %v1042_v7 = vpack.c.bf16 %v1034_v38, %v1033_v29  ;;  %v3628_v38 = vld [vmem:[%s4355_s10 + $0x58] sm:$0xff] }
 0x5ae   : > { %v1989_v28 = vmul.f32 %v3584_v49, %v4778_v17 }
 0x5af   : > { %2838 = vst [vmem:[%s4659_s12 + $0xf8] sm:$0xff] %v1991_v32  ;;  %v2016_v50 = vpack.c.bf16 %v1991_v32, %v1990_v56  ;;  %v3624_v56 = vld [vmem:[%s4355_s10 + $0x28] sm:$0xff] }
 0x5b0   : > { %2836 = vst [vmem:[%s4659_s12 + $0xe8] sm:$0xff] %v1989_v28  ;;  %v2015_v8 = vpack.c.bf16 %v1989_v28, %v1988_v42  ;;  %3249 = vmatpush3.bf16.msra.mxu0 %v1040_v31  ;;  %v3626_v28 = vld [vmem:[%s4355_s10 + $0x50] sm:$0xff] }
 0x5b1   : > { %3250 = vmatprep.subr.bf16.mxu0 %v1041_v61 }
 0x5b2   : > { %3242 = vmatprep.mubr.bf16.mxu1 %v2015_v8 }
 0x5b3   : > { %3235 = vmatmul.mubr.bf16.gmra.mrb[68].mxu0 %v2012_v62  ;;  %3243 = vmatmul.mubr.bf16.gmra.mrb[52].mxu1 %v2016_v50  ;;  %v3627_v50 = vld [vmem:[%s4355_s10 + $0x40] sm:$0xff] }
 0x5b4   : > { %3251 = vmatpush3.bf16.msra.mxu0 %v1041_v61 }
 0x5b5   : > { %3252 = vmatprep.subr.bf16.mxu0 %v1042_v7 }
 0x5b8   : > { %3253 = vmatpush3.bf16.msra.mxu0 %v1042_v7 }
 0x67e   : > { %v3232_v33 = vpop.f32.mrb[64].mxu0  ;;  %v3240_v17 = vpop.f32.mrb[48].mxu1 }
 0x67f   : > { %v2083_v60 = vpop.f32.mrb[65].mxu0  ;;  %v2115_v22 = vpop.f32.mrb[49].mxu1 }
 0x680   : > { %v3233_v34 = vpop.f32.mrb[66].mxu0  ;;  %v3241_v53 = vpop.f32.mrb[50].mxu1 }
 0x681   : > { %v2147_v4 = vpack.c.bf16 %v3233_v34, %v3232_v33  ;;  %v2151_v18 = vpack.c.bf16 %v3241_v53, %v3240_v17  ;;  %v2086_v55 = vpop.f32.mrb[67].mxu0  ;;  %v2118_v15 = vpop.f32.mrb[51].mxu1  ;;  %v3629_v33 = vld [vmem:[%s4355_s10 + $0x48] sm:$0xff] }
 0x682   : > { %v2146_v21 = vpack.c.bf16 %v2086_v55, %v2083_v60  ;;  %v2150_v30 = vpack.c.bf16 %v2118_v15, %v2115_v22  ;;  %v3630_v60 = vld [vmem:[%s4355_s10 + $0x60] sm:$0xff]  ;;  %v3631_v34 = vld [vmem:[%s4355_s10 + $0x68] sm:$0xff] }
 0x684   : > { %3254 = vmatprep.mubr.msk.bf16.mxu0 %vm1083_vm0, %v2146_v21 }
 0x685   : > { %3255 = vmatmul.mubr.msk.bf16.vlgmr.msra.gmra.mrb[48].mxu0 %vm1083_vm0, %v2147_v4  ;;  %v3632_v4 = vld [vmem:[%s4355_s10 + $0x78] sm:$0xff] }
 0x686   : > { %v3236_v13 = vpop.f32.mrb[68].mxu0  ;;  %v3244_v62 = vpop.f32.mrb[52].mxu1 }
 0x687   : > { %v2099_v57 = vpop.f32.mrb[69].mxu0  ;;  %v2131_v6 = vpop.f32.mrb[53].mxu1 }
 0x688   : > { %v3237_v63 = vpop.f32.mrb[70].mxu0  ;;  %v3245_v59 = vpop.f32.mrb[54].mxu1 }
 0x689   : > { %v2149_v27 = vpack.c.bf16 %v3237_v63, %v3236_v13  ;;  %v2153_v19 = vpack.c.bf16 %v3245_v59, %v3244_v62  ;;  %v2102_v24 = vpop.f32.mrb[71].mxu0  ;;  %v2134_v36 = vpop.f32.mrb[55].mxu1 }
 0x68a   : > { %v2148_v58 = vpack.c.bf16 %v2102_v24, %v2099_v57  ;;  %v2152_v14 = vpack.c.bf16 %v2134_v36, %v2131_v6 }
 0x68c   : > { %3258 = vmatprep.mubr.msk.bf16.mxu0 %vm1083_vm0, %v2148_v58 }
 0x68d   : > { %3259 = vmatmul.mubr.msk.bf16.gmra.mrb[52].mxu0 %vm1083_vm0, %v2149_v27 }
 0x68e   : > { %3262 = vmatprep.mubr.msk.bf16.mxu0 %vm1083_vm0, %v2150_v30 }
 0x695   : > { %3263 = vmatmul.mubr.msk.bf16.gmra.mrb[56].mxu0 %vm1083_vm0, %v2151_v18 }
 0x696   : > { %3266 = vmatprep.mubr.msk.bf16.mxu0 %vm1083_vm0, %v2152_v14 }
 0x69d   : > { %3267 = vmatmul.mubr.msk.bf16.gmra.mrb[60].mxu0 %vm1083_vm0, %v2153_v19 }
 0x758   : > { %v3256_v1 = vpop.f32.mrb[48].mxu0 }
 0x759   : > { %v4863_v2 = vadd.f32 %v3617_v37, %v3256_v1  ;;  %v2212_v5 = vpop.f32.mrb[49].mxu0 }
 0x75a   : > { %v3257_v35 = vpop.f32.mrb[50].mxu0  ;;  %v3287_v47 = vadd.f32 %v3618_v10, %v2212_v5 }
 0x75b   : > { %2295 = vadd.xlane.f32.xlu1 %v4863_v2  ;;  %v2215_v20 = vpop.f32.mrb[51].mxu0  ;;  %v4868_v12 = vadd.f32 %v3619_v54, %v3257_v35 }
 0x75c   : > { %v4876_v40 = vadd.f32 %v3621_v39, %v2215_v20 }
 0x75f   : > { %2291 = vadd.xlane.f32.xlu1 %v3287_v47 }
 0x760   : > { %v3260_v11 = vpop.f32.mrb[52].mxu0 }
 0x761   : > { %v4871_v16 = vadd.f32 %v3620_v3, %v3260_v11  ;;  %v2228_v51 = vpop.f32.mrb[53].mxu0 }
 0x762   : > { %v3261_v44 = vpop.f32.mrb[54].mxu0  ;;  %v4880_v41 = vadd.f32 %v3622_v52, %v2228_v51 }
 0x763   : > { %2297 = vadd.xlane.f32.xlu1 %v4868_v12  ;;  %2303 = vadd.xlane.f32.xlu0 %v4871_v16  ;;  %v2231_v0 = vpop.f32.mrb[55].mxu0  ;;  %v4884_v26 = vadd.f32 %v3623_v45, %v3261_v44 }
 0x764   : > { %v4888_v46 = vadd.f32 %v3624_v56, %v2231_v0 }
 0x767   : > { %2293 = vadd.xlane.f32.xlu1 %v4876_v40 }
 0x768   : > { %v3264_v23 = vpop.f32.mrb[56].mxu0 }
 0x769   : > { %v2244_v25 = vpop.f32.mrb[57].mxu0  ;;  %v3294_v8 = vadd.f32 %v3626_v28, %v3264_v23 }
 0x76a   : > { %v3265_v42 = vpop.f32.mrb[58].mxu0  ;;  %v4897_v29 = vadd.f32 %v3627_v50, %v2244_v25 }
 0x76b   : > { %2299 = vadd.xlane.f32.xlu1 %v4880_v41  ;;  %v2247_v43 = vpop.f32.mrb[59].mxu0  ;;  %v4901_v7 = vadd.f32 %v3628_v38, %v3265_v42 }
 0x76c   : > { %v4905_v17 = vadd.f32 %v3629_v33, %v2247_v43 }
 0x76f   : > { %2305 = vadd.xlane.f32.xlu1 %v4884_v26 }
 0x770   : > { %v3268_v31 = vpop.f32.mrb[60].mxu0 }
 0x771   : > { %v4891_v9 = vadd.f32 %v3625_v48, %v3268_v31  ;;  %v2260_v49 = vpop.f32.mrb[61].mxu0 }
 0x772   : > { %v3269_v32 = vpop.f32.mrb[62].mxu0  ;;  %v4909_v22 = vadd.f32 %v3630_v60, %v2260_v49 }
 0x773   : > { %2301 = vadd.xlane.f32.xlu1 %v4888_v46  ;;  %2319 = vadd.xlane.f32.xlu0 %v4891_v9  ;;  %v2263_v61 = vpop.f32.mrb[63].mxu0  ;;  %v4917_v18 = vadd.f32 %v3632_v4, %v3269_v32 }
 0x774   : > { %v4913_v53 = vadd.f32 %v3631_v34, %v2263_v61 }
 0x777   : > { %2311 = vadd.xlane.f32.xlu1 %v3294_v8 }
 0x77b   : > { %2307 = vadd.xlane.f32.xlu1 %v4897_v29 }
 0x77f   : > { %2313 = vadd.xlane.f32.xlu1 %v4901_v7 }
 0x783   : > { %2309 = vadd.xlane.f32.xlu1 %v4905_v17 }
 0x787   : > { %2315 = vadd.xlane.f32.xlu1 %v4909_v22 }
 0x78b   : > { %2317 = vadd.xlane.f32.xlu1 %v4913_v53 }
 0x78f   : > { %2321 = vadd.xlane.f32.xlu1 %v4917_v18 }
 0x7e8   : > { %v2296_v55 = vpop.xlane.xlu1 %2295 }
 0x7e9   : > { %v2326_v15 = vmul.f32 0.0078125, %v2296_v55 }
 0x7eb   : > { %v4921_v21 = vsub.f32 %v4863_v2, %v2326_v15 }
 0x7ec   : > { %v2292_v30 = vpop.xlane.xlu1 %2291 }
 0x7ed   : > { %v2324_v13 = vmul.f32 0.0078125, %v2292_v30  ;;  %v2358_v62 = vmul.f32 %v4921_v21, %v4921_v21 }
 0x7ef   : > { %v4925_v57 = vsub.f32 %v3287_v47, %v2324_v13  ;;  %2376 = vadd.xlane.f32.xlu0 %v2358_v62 }
 0x7f0   : > { %v2298_v6 = vpop.xlane.xlu1 %2297  ;;  %v2304_v63 = vpop.xlane.xlu0 %2303 }
 0x7f1   : > { %v2327_v59 = vmul.f32 0.0078125, %v2298_v6  ;;  %v2330_v27 = vmul.f32 0.0078125, %v2304_v63  ;;  %v2356_v19 = vmul.f32 %v4925_v57, %v4925_v57 }
 0x7f3   : > { %v4930_v24 = vsub.f32 %v4868_v12, %v2327_v59  ;;  %v4933_v36 = vsub.f32 %v4871_v16, %v2330_v27  ;;  %2372 = vadd.xlane.f32.xlu0 %v2356_v19 }
 0x7f4   : > { %v2294_v58 = vpop.xlane.xlu1 %2293 }
 0x7f5   : > { %v2325_v14 = vmul.f32 0.0078125, %v2294_v58  ;;  %v2362_v1 = vmul.f32 %v4933_v36, %v4933_v36  ;;  %v2359_v37 = vmul.f32 %v4930_v24, %v4930_v24 }
 0x7f7   : > { %v4940_v2 = vsub.f32 %v4876_v40, %v2325_v14  ;;  %2384 = vadd.xlane.f32.xlu0 %v2362_v1  ;;  %2378 = vadd.xlane.f32.xlu1 %v2359_v37 }
 0x7f8   : > { %v2300_v5 = vpop.xlane.xlu1 %2299 }
 0x7f9   : > { %v2328_v35 = vmul.f32 0.0078125, %v2300_v5  ;;  %v2357_v20 = vmul.f32 %v4940_v2, %v4940_v2 }
 0x7fb   : > { %v4945_v10 = vsub.f32 %v4880_v41, %v2328_v35  ;;  %2374 = vadd.xlane.f32.xlu1 %v2357_v20 }
 0x7fc   : > { %v2306_v47 = vpop.xlane.xlu1 %2305 }
 0x7fd   : > { %v2331_v11 = vmul.f32 0.0078125, %v2306_v47  ;;  %v2360_v54 = vmul.f32 %v4945_v10, %v4945_v10 }
 0x7ff   : > { %v4950_v12 = vsub.f32 %v4884_v26, %v2331_v11  ;;  %2380 = vadd.xlane.f32.xlu0 %v2360_v54 }
 0x800   : > { %v2302_v3 = vpop.xlane.xlu1 %2301  ;;  %v2320_v49 = vpop.xlane.xlu0 %2319 }
 0x801   : > { %v2329_v16 = vmul.f32 0.0078125, %v2302_v3  ;;  %v2363_v51 = vmul.f32 %v4950_v12, %v4950_v12  ;;  %v2338_v28 = vmul.f32 0.0078125, %v2320_v49 }
 0x803   : > { %v4955_v44 = vsub.f32 %v4888_v46, %v2329_v16  ;;  %2386 = vadd.xlane.f32.xlu1 %v2363_v51 }
 0x804   : > { %v2312_v0 = vpop.xlane.xlu1 %2311 }
 0x805   : > { %v2334_v39 = vmul.f32 0.0078125, %v2312_v0  ;;  %v2361_v40 = vmul.f32 %v4955_v44, %v4955_v44 }
 0x807   : > { %v4959_v23 = vsub.f32 %v3294_v8, %v2334_v39  ;;  %2382 = vadd.xlane.f32.xlu1 %v2361_v40 }
 0x808   : > { %v2308_v52 = vpop.xlane.xlu1 %2307 }
 0x809   : > { %v2332_v41 = vmul.f32 0.0078125, %v2308_v52  ;;  %v2366_v25 = vmul.f32 %v4959_v23, %v4959_v23 }
 0x80b   : > { %v4964_v42 = vsub.f32 %v4897_v29, %v2332_v41  ;;  %2392 = vadd.xlane.f32.xlu0 %v2366_v25 }
 0x80c   : > { %v2314_v43 = vpop.xlane.xlu1 %2313 }
 0x80d   : > { %v2335_v45 = vmul.f32 0.0078125, %v2314_v43  ;;  %v2364_v26 = vmul.f32 %v4964_v42, %v4964_v42 }
 0x80f   : > { %v4969_v31 = vsub.f32 %v4901_v7, %v2335_v45  ;;  %2388 = vadd.xlane.f32.xlu0 %v2364_v26  ;;  %v4982_v7 = vsub.f32 %v4891_v9, %v2338_v28 }
 0x810   : > { %v2310_v56 = vpop.xlane.xlu1 %2309 }
 0x811   : > { %v2333_v46 = vmul.f32 0.0078125, %v2310_v56  ;;  %v2367_v48 = vmul.f32 %v4969_v31, %v4969_v31  ;;  %v2370_v4 = vmul.f32 %v4982_v7, %v4982_v7 }
 0x813   : > { %v4974_v32 = vsub.f32 %v4905_v17, %v2333_v46  ;;  %2394 = vadd.xlane.f32.xlu1 %v2367_v48 }
 0x814   : > { %v2316_v61 = vpop.xlane.xlu1 %2315 }
 0x815   : > { %v2336_v8 = vmul.f32 0.0078125, %v2316_v61  ;;  %v2365_v50 = vmul.f32 %v4974_v32, %v4974_v32 }
 0x817   : > { %v4979_v29 = vsub.f32 %v4909_v22, %v2336_v8  ;;  %2390 = vadd.xlane.f32.xlu1 %v2365_v50 }
 0x818   : > { %v2318_v38 = vpop.xlane.xlu1 %2317 }
 0x819   : > { %v2337_v33 = vmul.f32 0.0078125, %v2318_v38  ;;  %v2368_v17 = vmul.f32 %v4979_v29, %v4979_v29 }
 0x81b   : > { %v4987_v60 = vsub.f32 %v4913_v53, %v2337_v33  ;;  %2396 = vadd.xlane.f32.xlu0 %v2368_v17 }
 0x81c   : > { %v2322_v34 = vpop.xlane.xlu1 %2321 }
 0x81d   : > { %v2339_v22 = vmul.f32 0.0078125, %v2322_v34  ;;  %v2369_v55 = vmul.f32 %v4987_v60, %v4987_v60 }
 0x81f   : > { %v4994_v9 = vsub.f32 %v4917_v18, %v2339_v22  ;;  %2400 = vadd.xlane.f32.xlu0 %v2370_v4  ;;  %2398 = vadd.xlane.f32.xlu1 %v2369_v55 }
 0x821   : > { %v2371_v15 = vmul.f32 %v4994_v9, %v4994_v9 }
 0x823   : > { %2402 = vadd.xlane.f32.xlu1 %v2371_v15 }
 0x824   : > { %3848 = shalt.err (!%p3845_p0)
}
 0x825   : > { %s3849_s29 = scalar_lea.hbm %s5003_s22, 4096  ;;  %s3853_s23 = scalar_lea.hbm %s5252_s1, 8192 }
 0x826   : > { %p3850_p8 = scmp.ne.s32.totalorder %s5003_s22, %s3849_s29  ;;  %p3854_p2 = scmp.lt.u32.totalorder %s5003_s22, %s5252_s1 }
 0x827   : > { %p3855_p10 = scmp.lt.u32.totalorder %s3853_s23, %s3849_s29  ;;  %p3857_p7 = scmp.lt.u32.totalorder %s3849_s29, %s5003_s22 }
 0x828   : > { %p3851_p3 = pnand %p3850_p8, %p5253_p6 }
 0x829   : > { %p3856_p5 = por %p3855_p10, %p3854_p2 }
 0x82a   : > { %p3852_p11 = pneg %p3851_p3 }
 0x82b   : > { %p3858_p4 = por %p3857_p7, %p3856_p5 }
 0x82d   : > { %p3859_p1 = pnand %p3858_p4, %p3852_p11 }
 0x82f   : > { %3862 = shalt.err (!%p3859_p1)
}
 0x830   : > { %s3974_s19 = smov 128   ;;  %s3975_s21 = smov 8  }
 0x831   : > { %3357 = dma.vmem_to_hbm [thread:$0]  (%p5253_p6), %s5005_s30, 4096, %s5003_s22, %s2536_s24, %s3974_s19, %s3974_s19, %s3975_s21  }
 0x832   : > { %s5254_s30 = sld [smem:[#allocation36_spill]]  ;;  %s5255_s17 = sld [smem:[#allocation37_spill]] }
 0x833   : > { %s5049_s22 = scalar_lea.vmem [#allocation16], %s4351_s27  ;;  %s2860_s27 = sshll.u32 %s5249_s26, 11 }
 0x834   : > { %s2551_s24 = sshll.u32 %s5049_s22, 4  ;;  %s5256_s18 = sld [smem:[#allocation38_spill]]  ;;  %s5117_s24 = int_to_ptr.vmem [resolvable:$true] %s2551_s24 }
 0x835   : > { %s2531_s10 = scalar_lea.sflag [#allocation6], %s4348_s13  ;;  %s3863_s26 = scalar_lea.vmem %s5117_s24, 2048 }
 0x836   : > { %p3864_p13 = scmp.ne.s32.totalorder %s5117_s24, %s3863_s26  ;;  %s3976_s3 = smov [#allocation16]  }
 0x837   : > { %s3867_s23 = sshll.u32 %s3976_s3, 4  ;;  %s3868_s23 = int_to_ptr.vmem [resolvable:$false] %s3867_s23 }
 0x838   : > { %v5037_v35 = vld [vmem:[%s5254_s30] ss:$0 sm:$0xff]  ;;  %p3865_p12 = pnand %p3864_p13, %p5253_p6  ;;  %s3869_s5 = scalar_lea.vmem %s3868_s23, 4096 }
 0x839   : > { %v5043_v54 = vld [vmem:[%s5255_s17] ss:$0 sm:$0xff]  ;;  %p3870_p0 = scmp.lt.s32.totalorder %s5117_s24, %s3868_s23  ;;  %p3871_p8 = scmp.lt.s32.totalorder %s3869_s5, %s3863_s26 }
 0x83a   : > { %s5257_s25 = smov %s5256_s18  ;;  %s5115_s29 = scalar_lea.hbm %s5256_s18, %s2860_s27 }
 0x83b   : > { %p3866_p9 = pneg %p3865_p12  ;;  %p3872_p3 = por %p3871_p8, %p3870_p0 }
 0x83d   : > { %p3873_p11 = pnand %p3872_p3, %p3866_p9 }
 0x87c   : > { %v2377_v53 = vpop.xlane.xlu0 %2376 }
 0x87d   : > { %v2406_v18 = vmul.f32 0.0078125, %v2377_v53 }
 0x87f   : > { %v2422_v30 = vadd.f32 1e-06, %v2406_v18 }
 0x880   : > { %v2373_v13 = vpop.xlane.xlu0 %2372 }
 0x881   : > { %3585 = vrsqrt.f32 %v2422_v30  ;;  %v2404_v62 = vmul.f32 0.0078125, %v2373_v13 }
 0x883   : > { %v2420_v6 = vadd.f32 1e-06, %v2404_v62 }
 0x884   : > { %v2385_v63 = vpop.xlane.xlu0 %2384  ;;  %v2379_v59 = vpop.xlane.xlu1 %2378 }
 0x885   : > { %3587 = vrsqrt.f32 %v2420_v6  ;;  %v2410_v27 = vmul.f32 0.0078125, %v2385_v63  ;;  %v2407_v19 = vmul.f32 0.0078125, %v2379_v59 }
 0x887   : > { %v2426_v58 = vadd.f32 1e-06, %v2410_v27  ;;  %v2423_v14 = vadd.f32 1e-06, %v2407_v19 }
 0x888   : > { %v2375_v1 = vpop.xlane.xlu1 %2374 }
 0x889   : > { %3589 = vrsqrt.f32 %v2426_v58  ;;  %v2405_v37 = vmul.f32 0.0078125, %v2375_v1 }
 0x88a   : > { %3591 = vrsqrt.f32 %v2423_v14 }
 0x88b   : > { %v3586_v5 = vpop.eup %3585  ;;  %v2421_v20 = vadd.f32 1e-06, %v2405_v37 }
 0x88c   : > { %v2454_v47 = vmul.f32 %v3586_v5, %v4921_v21  ;;  %v2381_v11 = vpop.xlane.xlu0 %2380 }
 0x88d   : > { %3593 = vrsqrt.f32 %v2421_v20  ;;  %v2408_v3 = vmul.f32 0.0078125, %v2381_v11 }
 0x88e   : > { %v2477_v16 = vmul.f32 %v5037_v35, %v2454_v47 }
 0x88f   : > { %v3588_v51 = vpop.eup %3587  ;;  %v2424_v0 = vadd.f32 1e-06, %v2408_v3 }
 0x890   : > { %v2500_v39 = vadd.f32 %v5043_v54, %v2477_v16  ;;  %v2452_v40 = vmul.f32 %v3588_v51, %v4925_v57  ;;  %v2387_v52 = vpop.xlane.xlu1 %2386 }
 0x891   : > { %3595 = vrsqrt.f32 %v2424_v0  ;;  %v2411_v41 = vmul.f32 0.0078125, %v2387_v52 }
 0x892   : > { %2516 = vst [vmem:[%s5049_s22 + $0x10] sm:$0xff] %v2500_v39  ;;  %v2475_v21 = vmul.f32 %v5037_v35, %v2452_v40 }
 0x893   : > { %v3590_v25 = vpop.eup %3589  ;;  %v2427_v43 = vadd.f32 1e-06, %v2411_v41 }
 0x894   : > { %v3592_v45 = vpop.eup %3591  ;;  %v2498_v26 = vadd.f32 %v5043_v54, %v2475_v21  ;;  %v2458_v56 = vmul.f32 %v3590_v25, %v4933_v36  ;;  %v2383_v46 = vpop.xlane.xlu1 %2382 }
 0x895   : > { %v2455_v57 = vmul.f32 %v3592_v45, %v4930_v24  ;;  %3597 = vrsqrt.f32 %v2427_v43  ;;  %v2409_v48 = vmul.f32 0.0078125, %v2383_v46 }
 0x896   : > { %2514 = vst [vmem:[%s5049_s22] sm:$0xff] %v2498_v26  ;;  %v2481_v49 = vmul.f32 %v5037_v35, %v2458_v56 }
 0x897   : > { %v3594_v61 = vpop.eup %3593  ;;  %v2478_v28 = vmul.f32 %v5037_v35, %v2455_v57  ;;  %v2425_v8 = vadd.f32 1e-06, %v2409_v48 }
 0x898   : > { %v2504_v50 = vadd.f32 %v5043_v54, %v2481_v49  ;;  %v2453_v38 = vmul.f32 %v3594_v61, %v4940_v2  ;;  %v2393_v36 = vpop.xlane.xlu0 %2392 }
 0x899   : > { %v2501_v33 = vadd.f32 %v5043_v54, %v2478_v28  ;;  %3599 = vrsqrt.f32 %v2425_v8  ;;  %v2414_v24 = vmul.f32 0.0078125, %v2393_v36 }
 0x89a   : > { %2520 = vst [vmem:[%s5049_s22 + $0x30] sm:$0xff] %v2504_v50  ;;  %v2476_v17 = vmul.f32 %v5037_v35, %v2453_v38 }
 0x89b   : > { %v3596_v34 = vpop.eup %3595  ;;  %2517 = vst [vmem:[%s5049_s22 + $0x18] sm:$0xff] %v2501_v33  ;;  %v2430_v22 = vadd.f32 1e-06, %v2414_v24 }
 0x89c   : > { %v2499_v4 = vadd.f32 %v5043_v54, %v2476_v17  ;;  %v2456_v55 = vmul.f32 %v3596_v34, %v4945_v10  ;;  %v2389_v15 = vpop.xlane.xlu0 %2388 }
 0x89d   : > { %3601 = vrsqrt.f32 %v2430_v22  ;;  %v2412_v53 = vmul.f32 0.0078125, %v2389_v15 }
 0x89e   : > { %2515 = vst [vmem:[%s5049_s22 + $0x8] sm:$0xff] %v2499_v4  ;;  %v2479_v2 = vmul.f32 %v5037_v35, %v2456_v55 }
 0x89f   : > { %v3598_v18 = vpop.eup %3597  ;;  %v2428_v30 = vadd.f32 1e-06, %v2412_v53 }
 0x8a0   : > { %v2502_v13 = vadd.f32 %v5043_v54, %v2479_v2  ;;  %v2459_v62 = vmul.f32 %v3598_v18, %v4950_v12  ;;  %v2395_v6 = vpop.xlane.xlu1 %2394 }
 0x8a1   : > { %3603 = vrsqrt.f32 %v2428_v30  ;;  %v2415_v63 = vmul.f32 0.0078125, %v2395_v6 }
 0x8a2   : > { %2518 = vst [vmem:[%s5049_s22 + $0x20] sm:$0xff] %v2502_v13  ;;  %v2482_v59 = vmul.f32 %v5037_v35, %v2459_v62 }
 0x8a3   : > { %v3600_v10 = vpop.eup %3599  ;;  %v2431_v27 = vadd.f32 1e-06, %v2415_v63 }
 0x8a4   : > { %v2505_v19 = vadd.f32 %v5043_v54, %v2482_v59  ;;  %v2457_v58 = vmul.f32 %v3600_v10, %v4955_v44  ;;  %v2391_v14 = vpop.xlane.xlu1 %2390 }
 0x8a5   : > { %3605 = vrsqrt.f32 %v2431_v27  ;;  %v2413_v1 = vmul.f32 0.0078125, %v2391_v14 }
 0x8a6   : > { %2521 = vst [vmem:[%s5049_s22 + $0x38] sm:$0xff] %v2505_v19  ;;  %v2480_v37 = vmul.f32 %v5037_v35, %v2457_v58 }
 0x8a7   : > { %v3602_v12 = vpop.eup %3601  ;;  %v2429_v5 = vadd.f32 1e-06, %v2413_v1 }
 0x8a8   : > { %v2503_v20 = vadd.f32 %v5043_v54, %v2480_v37  ;;  %v2462_v47 = vmul.f32 %v3602_v12, %v4959_v23  ;;  %v2397_v11 = vpop.xlane.xlu0 %2396 }
 0x8a9   : > { %3607 = vrsqrt.f32 %v2429_v5  ;;  %v2416_v3 = vmul.f32 0.0078125, %v2397_v11 }
 0x8aa   : > { %2519 = vst [vmem:[%s5049_s22 + $0x28] sm:$0xff] %v2503_v20  ;;  %v2485_v16 = vmul.f32 %v5037_v35, %v2462_v47 }
 0x8ab   : > { %v3604_v44 = vpop.eup %3603  ;;  %v2432_v51 = vadd.f32 1e-06, %v2416_v3 }
 0x8ac   : > { %v2508_v0 = vadd.f32 %v5043_v54, %v2485_v16  ;;  %v2460_v39 = vmul.f32 %v3604_v44, %v4964_v42  ;;  %v2401_v40 = vpop.xlane.xlu0 %2400  ;;  %v2399_v52 = vpop.xlane.xlu1 %2398 }
 0x8ad   : > { %3609 = vrsqrt.f32 %v2432_v51  ;;  %v2418_v41 = vmul.f32 0.0078125, %v2401_v40  ;;  %v2417_v21 = vmul.f32 0.0078125, %v2399_v52 }
 0x8ae   : > { %2524 = vst [vmem:[%s5049_s22 + $0x50] sm:$0xff] %v2508_v0  ;;  %v2483_v23 = vmul.f32 %v5037_v35, %v2460_v39 }
 0x8af   : > { %v3606_v25 = vpop.eup %3605  ;;  %v2434_v43 = vadd.f32 1e-06, %v2418_v41  ;;  %v2433_v45 = vadd.f32 1e-06, %v2417_v21 }
 0x8b0   : > { %v2506_v26 = vadd.f32 %v5043_v54, %v2483_v23  ;;  %v2463_v56 = vmul.f32 %v3606_v25, %v4969_v31  ;;  %v2403_v46 = vpop.xlane.xlu1 %2402 }
 0x8b1   : > { %3611 = vrsqrt.f32 %v2434_v43  ;;  %v2419_v42 = vmul.f32 0.0078125, %v2403_v46 }
 0x8b2   : > { %2522 = vst [vmem:[%s5049_s22 + $0x40] sm:$0xff] %v2506_v26  ;;  %v2486_v57 = vmul.f32 %v5037_v35, %v2463_v56  ;;  %3613 = vrsqrt.f32 %v2433_v45 }
 0x8b3   : > { %v3608_v48 = vpop.eup %3607  ;;  %v2435_v49 = vadd.f32 1e-06, %v2419_v42 }
 0x8b4   : > { %v2509_v61 = vadd.f32 %v5043_v54, %v2486_v57  ;;  %v2461_v28 = vmul.f32 %v3608_v48, %v4974_v32 }
 0x8b5   : > { %3615 = vrsqrt.f32 %v2435_v49 }
 0x8b6   : > { %2525 = vst [vmem:[%s5049_s22 + $0x58] sm:$0xff] %v2509_v61  ;;  %v2484_v8 = vmul.f32 %v5037_v35, %v2461_v28 }
 0x8b7   : > { %v3610_v31 = vpop.eup %3609 }
 0x8b8   : > { %v2507_v50 = vadd.f32 %v5043_v54, %v2484_v8  ;;  %v2464_v38 = vmul.f32 %v3610_v31, %v4979_v29 }
 0x8ba   : > { %2523 = vst [vmem:[%s5049_s22 + $0x48] sm:$0xff] %v2507_v50  ;;  %v2487_v36 = vmul.f32 %v5037_v35, %v2464_v38 }
 0x8bb   : > { %v3612_v33 = vpop.eup %3611 }
 0x8bc   : > { %v3614_v24 = vpop.eup %3613  ;;  %v2510_v32 = vadd.f32 %v5043_v54, %v2487_v36  ;;  %v2466_v17 = vmul.f32 %v3612_v33, %v4982_v7 }
 0x8bd   : > { %v2465_v34 = vmul.f32 %v3614_v24, %v4987_v60 }
 0x8be   : > { %2526 = vst [vmem:[%s5049_s22 + $0x60] sm:$0xff] %v2510_v32  ;;  %v2489_v22 = vmul.f32 %v5037_v35, %v2466_v17 }
 0x8bf   : > { %v3616_v29 = vpop.eup %3615  ;;  %v2488_v4 = vmul.f32 %v5037_v35, %v2465_v34 }
 0x8c0   : > { %v2512_v55 = vadd.f32 %v5043_v54, %v2489_v22  ;;  %v2467_v15 = vmul.f32 %v3616_v29, %v4994_v9 }
 0x8c1   : > { %v2511_v53 = vadd.f32 %v5043_v54, %v2488_v4 }
 0x8c2   : > { %2528 = vst [vmem:[%s5049_s22 + $0x70] sm:$0xff] %v2512_v55  ;;  %v2490_v7 = vmul.f32 %v5037_v35, %v2467_v15 }
 0x8c3   : > { %2527 = vst [vmem:[%s5049_s22 + $0x68] sm:$0xff] %v2511_v53 }
 0x8c4   : > { %v2513_v60 = vadd.f32 %v5043_v54, %v2490_v7 }
 0x8c6   : > { %2529 = vst [vmem:[%s5049_s22 + $0x78] sm:$0xff] %v2513_v60 }
 0x8c7   : > { %3876 = shalt.err (!%p3873_p11)
}
 0x8c8   : > { %s3877_s9 = scalar_lea.hbm %s5115_s29, 2048  ;;  %s3881_s30 = scalar_lea.hbm %s5257_s25, 4096 }
 0x8c9   : > { %p3878_p2 = scmp.ne.s32.totalorder %s5115_s29, %s3877_s9  ;;  %p3882_p7 = scmp.lt.u32.totalorder %s5115_s29, %s5257_s25 }
 0x8ca   : > { %p3883_p4 = scmp.lt.u32.totalorder %s3881_s30, %s3877_s9  ;;  %p3885_p13 = scmp.lt.u32.totalorder %s3877_s9, %s5115_s29 }
 0x8cb   : > { %p3879_p10 = pnand %p3878_p2, %p5253_p6 }
 0x8cc   : > { %p3884_p1 = por %p3883_p4, %p3882_p7 }
 0x8cd   : > { %p3880_p5 = pneg %p3879_p10 }
 0x8ce   : > { %p3886_p12 = por %p3885_p13, %p3884_p1 }
 0x8d0   : > { %p3887_p9 = pnand %p3886_p12, %p3880_p5 }
 0x8d2   : > { %3890 = shalt.err (!%p3887_p9)
}
 0x8d3   : > { %3356 = dma.vmem_to_hbm [thread:$0]  (%p5253_p6), %s5117_s24, 2048, %s5115_s29, %s2531_s10, %s3974_s19, %s3974_s19, %s3975_s21  }
 0x8d4 PF: > { %s5258_s17 = sld [smem:[#allocation25_spill]]  ;;  %s5259_s22 = sld [smem:[#allocation29_spill]] }
 0x8d5   : > { %s5260_s27 = sld [smem:[#allocation28_spill]] }
 0x8da   : > { %s2584_s28 = sand.u32 1, %s5258_s17   ;;  %p5261_p0 = scmp.ne.s32.totalorder %s5259_s22, 0 }
 0x8db   : > { %p5262_p8 = scmp.ge.s32.totalorder %s5260_s27, 2  ;;  %s2585_s16 = scalar_lea.sflag [#allocation6], %s2584_s28 }
 0x8dd   : > { %p3384_p3 = pnand %p5262_p8, %p5261_p0 }
 0x8df   : > { %3932 = dma.done.wait (!%p3384_p3), %s2585_s16, 2048  }
 0x8e0   : > { %3934 = vsyncadd (!%p3384_p3), %s2585_s16, 4294965248  ;;  %s2594_s11 = scalar_lea.sflag [#allocation18], %s2584_s28 }
 0x8e1   : > { %3936 = dma.done.wait (!%p3384_p3), %s2594_s11, 4096  }
 0x8e2   : > { %3938 = vsyncadd (!%p3384_p3), %s2594_s11, 4294963200  ;;  %s35_s18 = sadd.s32 1, %s5260_s27   ;;  %s5263_s19 = sld [smem:[#allocation32_spill]] }
 0x8e3   : > { %p32_p11 = scmp.ge.s32.totalorder %s35_s18, 4   ;;  %s5264_s16 = sld [smem:[#allocation27_spill]] }
 0x8e4   : > { %s5265_s17 = sld [smem:[#allocation30_spill]]  ;;  %s5266_s13 = smov %s3945_s14 }
 0x8e5   : > { %s5267_s14 = smov %s3949_s15  ;;  %34 = sbr.rel (!%p32_p11) target bundleno = 20 (0x14), region = 163 }
 0x8e8   : > { %s5268_s15 = smov %s5263_s19 }
 0x8ec   :  { %2599 = vsyncpa [#allocation5], 1 }
 0x8ed   :  { %2601 = vsyncpa [#allocation5 + $0x1], 1 }
 0x8ee   :  { %2602 = vsyncpa [#allocation8], 1 }
 0x8ef   :  { %2604 = vsyncpa [#allocation8 + $0x1], 1 }
 0x8f0   :  { %2605 = vsyncpa [#allocation11], 1 }
 0x8f1   :  { %2606 = vsyncpa [#allocation14], 1 }
 0x8f2   :  { %2607 = vsyncpa [#allocation6], 1 }
 0x8f3   :  { %2609 = vsyncpa [#allocation6 + $0x1], 1 }
 0x8f4   :  { %2610 = vsyncpa [#allocation18], 1 }
 0x8f5   :  { %2612 = vsyncpa [#allocation18 + $0x1], 1 }

</bundles_post_ra>
